<compile_context>
chip_gen: v5e
topology: v5e:2x2
jax: 0.10.0
libtpu: 0.0.40
codegen_flags: <defaults>
</compile_context>

<pallas_src>
import functools

import numpy as np
import jax
import jax.numpy as jnp
from jax.experimental import pallas as pl
from jax.experimental.pallas import tpu as pltpu

_LRELU_SLOPE = 0.2
_BN_EPS = 1e-5
_CSA_LEN = 84          # csa_reduce(84) -> 42 -> 42 -> 21, matching the 21-dim embeddings


# ---------------------------------------------------------------------------
# Fused forward kernel (single invocation, everything stays in VMEM as values)
# ---------------------------------------------------------------------------

def _disc_fused_kernel(
    # data
    csa_ref, xcat_ref,
    # csa_reduce conv weights (C_out, 3*C_in) and bias columns (C_out, 1)
    wc1_ref, bc1_ref, wc2_ref, bc2_ref, wc3_ref, bc3_ref,
    # stride-2 decimation / re-padding selection matrices (0/1 constants)
    dp1_ref, dp3_ref, dpc1_ref, dpc2_ref, dpc3_ref,
    # interior (valid-lane) masks, (1, B*Lp)
    m44_ref, m23_ref, m13_ref, m8_ref,
    # embedding: lane-expansion matrix (B, B*23) + packed weight/bias tiles (7, B*23)
    espread_ref, emb_ref,
    # classifier conv weights (bias omitted: cancels under train-mode BN)
    wk1_ref, wk2_ref, wk3_ref,
    # BatchNorm gamma/beta packs (C, 2)
    gb1_ref, gb2_ref, gb3_ref,
    # head
    fc1w_ref, fc1b_ref, fc2w_ref, fc2b_ref,
    # output (1, B) lane-dense
    o_ref,
    *, batch):

    B = batch
    f32 = jnp.float32

    def lrelu(v):
        return jnp.maximum(v, _LRELU_SLOPE * v)

    def shl(a, j):
        # Shift left along lanes by j with zero fill (pure value op).
        if j == 0:
            return a
        return jnp.concatenate([a[:, j:], jnp.zeros((a.shape[0], j), f32)], axis=1)

    def taps(a):
        # im2col for a k=3 "same" conv, built fully in-register: rows j*C_in + c.
        return jnp.concatenate([a, shl(a, 1), shl(a, 2)], axis=0)

    def bn_lrelu(pre, gb_ref, count, mask):
        # Training-mode BatchNorm1d (biased batch variance, centered two-pass)
        # followed by LeakyReLU.  `pre` has exact zeros on border lanes.
        inv_n = 1.0 / float(count)
        mean = jnp.sum(pre, axis=-1, keepdims=True) * inv_n
        d = pre - mean
        if mask is not None:
            d = d * mask                       # zero the border lanes again
        var = jnp.sum(d * d, axis=-1, keepdims=True) * inv_n
        scale = jax.lax.rsqrt(var + _BN_EPS) * gb_ref[:, 0:1]
        out = lrelu(d * scale + gb_ref[:, 1:2])
        if mask is not None:
            out = out * mask                   # restore zero padding for next conv
        return out

    m44 = m44_ref[...]
    m23 = m23_ref[...]

    # ---------------- csa_reduce ----------------
    a0 = csa_ref[...]                                             # (1, B*86) padded
    y = jnp.dot(wc1_ref[...], taps(a0), preferred_element_type=f32)
    y = jnp.dot(y, dp1_ref[...], preferred_element_type=f32)      # (16, B*44) stride-2 select + re-pad
    a1 = lrelu(y + bc1_ref[...]) * m44

    y = jnp.dot(wc2_ref[...], taps(a1), preferred_element_type=f32)        # stride-1 conv
    y = jnp.concatenate([jnp.zeros((y.shape[0], 1), f32), y[:, :-1]], axis=1)  # re-pad shift
    a2 = lrelu(y + bc2_ref[...]) * m44                            # (16, B*44)

    y = jnp.dot(wc3_ref[...], taps(a2), preferred_element_type=f32)
    y = jnp.dot(y, dp3_ref[...], preferred_element_type=f32)      # (1, B*23)
    a3 = lrelu(y + bc3_ref[...]) * m23                            # reduced csa, channel 0

    # ------------- dense embeddings (one expansion dot + VPU mul-adds) -------------
    xs = jnp.dot(xcat_ref[...], espread_ref[...], preferred_element_type=f32)  # (4, B*23)
    emb = emb_ref[...]                                            # tiles have zero borders
    r_diag = lrelu(xs[0:1] * emb[0:1] + emb[4:5])
    r_spiro = lrelu(xs[1:2] * emb[1:2] + xs[2:3] * emb[2:3] + emb[5:6])
    r_demo = lrelu(xs[3:4] * emb[3:4] + emb[6:7])

    cls_in = jnp.concatenate([a3, r_diag, r_spiro, r_demo], axis=0)   # (4, B*23)

    # ---------------- classifier convs + BatchNorm + LeakyReLU ----------------
    y = jnp.dot(wk1_ref[...], taps(cls_in), preferred_element_type=f32)
    y = jnp.dot(y, dpc1_ref[...], preferred_element_type=f32)     # (16, B*13)
    c1 = bn_lrelu(y, gb1_ref, B * 11, m13_ref[...])

    y = jnp.dot(wk2_ref[...], taps(c1), preferred_element_type=f32)
    y = jnp.dot(y, dpc2_ref[...], preferred_element_type=f32)     # (32, B*8)
    c2 = bn_lrelu(y, gb2_ref, B * 6, m8_ref[...])

    y = jnp.dot(wk3_ref[...], taps(c2), preferred_element_type=f32)
    y = jnp.dot(y, dpc3_ref[...], preferred_element_type=f32)     # (16, 3*B) position-major, all valid
    c3 = bn_lrelu(y, gb3_ref, B * 3, None)

    # ---------------- head: Flatten -> FC(48,24) -> ReLU -> FC(24,1) -> ReLU -> clamp(0,1)
    # Stack the 3 length positions onto sublanes -> (48, B); fc1 columns are
    # pre-permuted to the (l*16 + c) ordering in prepare_params.
    yb = jnp.concatenate([c3[:, 0:B], c3[:, B:2 * B], c3[:, 2 * B:3 * B]], axis=0)
    h = jnp.maximum(
        jnp.dot(fc1w_ref[...], yb, preferred_element_type=f32) + fc1b_ref[...], 0.0)
    o = jnp.dot(fc2w_ref[...], h, preferred_element_type=f32) + fc2b_ref[...]
    o_ref[...] = jnp.clip(o, 0.0, 1.0)       # ReLU then clamp(0,1) == clamp(0,1)


# ---------------------------------------------------------------------------
# Wrapper: pallas_call construction + one-time parameter packing
# ---------------------------------------------------------------------------

def make_forward(batch):
    B = batch
    f32 = jnp.float32
    kernel = functools.partial(_disc_fused_kernel, batch=B)

    def fwd(packed, csa, diagnosis, spirometry_label, demographic):
        # Layout plumbing only: per-batch zero-padded csa row and transposed
        # (feature, batch) dense-input pack; final (1,B) -> (B,1) transpose.
        csa_pad = jnp.pad(csa.astype(f32), ((0, 0), (1, 1))).reshape(1, B * (_CSA_LEN + 2))
        xcat = jnp.transpose(jnp.concatenate(
            [diagnosis, spirometry_label, demographic], axis=1).astype(f32))   # (4, B)
        args = (
            csa_pad, xcat,
            packed["wc1"], packed["bc1"], packed["wc2"], packed["bc2"],
            packed["wc3"], packed["bc3"],
            packed["dp1"], packed["dp3"], packed["dpc1"], packed["dpc2"], packed["dpc3"],
            packed["m44"], packed["m23"], packed["m13"], packed["m8"],
            packed["espread"], packed["emb"],
            packed["wk1"], packed["wk2"], packed["wk3"],
            packed["gb1"], packed["gb2"], packed["gb3"],
            packed["fc1_w"], packed["fc1_b"], packed["fc2_w"], packed["fc2_b"],
        )
        out = pl.pallas_call(
            kernel,
            out_shape=jax.ShapeDtypeStruct((1, B), f32),
            in_specs=[pl.BlockSpec(memory_space=pltpu.MemorySpace.VMEM)] * len(args),
            out_specs=pl.BlockSpec(memory_space=pltpu.MemorySpace.VMEM),
        )(*args)
        return jnp.transpose(out)                                  # (B, 1)

    return fwd


def prepare_params(p, batch):
    """Pack raw (PyTorch-layout) params into kernel-shaped constants, once."""
    B = batch
    f32 = jnp.float32

    def fuse_conv(w):                        # (Co, Ci, 3) -> (Co, 3*Ci), col = j*Ci + c
        co, ci, k = w.shape
        return jnp.transpose(w, (0, 2, 1)).reshape(co, k * ci).astype(f32)

    def col(b):
        return jnp.asarray(b, f32).reshape(-1, 1)

    def decim(l_in, l_out, stride, pos_major=False):
        # 0/1 matrix selecting valid stride-s conv outputs from the "same"-conv
        # result over padded lanes, and writing them back in padded layout
        # (or position-major unpadded layout for the final classifier conv).
        lp_in = l_in + 2
        if pos_major:
            d = np.zeros((B * lp_in, l_out * B), np.float32)
            for b in range(B):
                for o in range(l_out):
                    d[b * lp_in + stride * o, o * B + b] = 1.0
        else:
            lp_out = l_out + 2
            d = np.zeros((B * lp_in, B * lp_out), np.float32)
            for b in range(B):
                for o in range(l_out):
                    d[b * lp_in + stride * o, b * lp_out + 1 + o] = 1.0
        return jnp.asarray(d)

    def interior_mask(l_valid):
        m = np.zeros((B, l_valid + 2), np.float32)
        m[:, 1:-1] = 1.0
        return jnp.asarray(m.reshape(1, -1))

    def emb_row(v):                          # (21,) -> (1, B*23) tile with zero borders
        row = jnp.pad(jnp.asarray(v, f32).reshape(1, 21), ((0, 0), (1, 1)))
        return jnp.tile(row, (1, B))

    espread = np.zeros((B, B * 23), np.float32)
    for b in range(B):
        espread[b, b * 23:(b + 1) * 23] = 1.0

    emb_pack = jnp.concatenate([
        emb_row(p["emb_w"][:, 0]),
        emb_row(p["spiro_w"][:, 0]),
        emb_row(p["spiro_w"][:, 1]),
        emb_row(p["demo_w"][:, 0]),
        emb_row(p["emb_b"]),
        emb_row(p["spiro_b"]),
        emb_row(p["demo_b"]),
    ], axis=0)                               # (7, B*23)

    # fc1 column permutation: fc1_perm[:, l*16 + c] == fc1_w[:, c*3 + l]
    fc1_perm = jnp.transpose(p["fc1_w"].reshape(24, 16, 3), (0, 2, 1)).reshape(24, 48)

    return {
        "wc1": fuse_conv(p["csa1_w"]), "bc1": col(p["csa1_b"]),
        "wc2": fuse_conv(p["csa2_w"]), "bc2": col(p["csa2_b"]),
        "wc3": fuse_conv(p["csa3_w"]), "bc3": col(p["csa3_b"]),
        "dp1": decim(84, 42, 2), "dp3": decim(42, 21, 2),
        "dpc1": decim(21, 11, 2), "dpc2": decim(11, 6, 2),
        "dpc3": decim(6, 3, 2, pos_major=True),
        "m44": interior_mask(42), "m23": interior_mask(21),
        "m13": interior_mask(11), "m8": interior_mask(6),
        "espread": jnp.asarray(espread), "emb": emb_pack,
        # Classifier conv biases are intentionally dropped: a per-channel
        # constant shift is cancelled exactly by the train-mode BatchNorm.
        "wk1": fuse_conv(p["cls1_w"]), "wk2": fuse_conv(p["cls2_w"]),
        "wk3": fuse_conv(p["cls3_w"]),
        "gb1": jnp.stack([p["bn1_g"], p["bn1_b"]], axis=1).astype(f32),
        "gb2": jnp.stack([p["bn2_g"], p["bn2_b"]], axis=1).astype(f32),
        "gb3": jnp.stack([p["bn3_g"], p["bn3_b"]], axis=1).astype(f32),
        "fc1_w": fc1_perm.astype(f32), "fc1_b": col(p["fc1_b"]),
        "fc2_w": p["fc2_w"].astype(f32), "fc2_b": p["fc2_b"].reshape(1, 1).astype(f32),
    }


# ---------------------------------------------------------------------------
# Deterministic parameter init (PyTorch-default-style fan-in uniform)
# ---------------------------------------------------------------------------

def init_params(key):
    ks = iter(jax.random.split(key, 32))
    p = {}

    def conv(name, co, ci, k=3):
        bound = 1.0 / float(np.sqrt(ci * k))
        p[name + "_w"] = jax.random.uniform(next(ks), (co, ci, k), jnp.float32, -bound, bound)
        p[name + "_b"] = jax.random.uniform(next(ks), (co,), jnp.float32, -bound, bound)

    def lin(name, co, ci):
        bound = 1.0 / float(np.sqrt(ci))
        p[name + "_w"] = jax.random.uniform(next(ks), (co, ci), jnp.float32, -bound, bound)
        p[name + "_b"] = jax.random.uniform(next(ks), (co,), jnp.float32, -bound, bound)

    conv("csa1", 16, 1); conv("csa2", 16, 16); conv("csa3", 1, 16)
    lin("emb", 21, 1); lin("spiro", 21, 2); lin("demo", 21, 1)
    conv("cls1", 16, 4); conv("cls2", 32, 16); conv("cls3", 16, 32)
    lin("fc1", 24, 48); lin("fc2", 1, 24)
    # PyTorch BatchNorm defaults are (gamma=1, beta=0); perturb slightly so the
    # affine path is actually exercised by the self-check.
    for name, c in (("bn1", 16), ("bn2", 32), ("bn3", 16)):
        p[name + "_g"] = 1.0 + 0.1 * jax.random.normal(next(ks), (c,), jnp.float32)
        p[name + "_b"] = 0.1 * jax.random.normal(next(ks), (c,), jnp.float32)
    return p


# ---------------------------------------------------------------------------
# Pure-JAX reference (training-mode BatchNorm), used for the self-check
# ---------------------------------------------------------------------------

def reference_forward(p, csa, diagnosis, spirometry_label, demographic):
    HI = jax.lax.Precision.HIGHEST

    def lrelu(v):
        return jnp.maximum(v, _LRELU_SLOPE * v)

    def conv1d(x, w, b, stride):
        y = jax.lax.conv_general_dilated(
            x, w, window_strides=(stride,), padding=[(1, 1)],
            dimension_numbers=("NCH", "OIH", "NCH"), precision=HI)
        return y + b[None, :, None]

    def bn(x, g, b):
        mean = jnp.mean(x, axis=(0, 2), keepdims=True)
        var = jnp.mean(jnp.square(x - mean), axis=(0, 2), keepdims=True)
        return (x - mean) * jax.lax.rsqrt(var + _BN_EPS) * g[None, :, None] + b[None, :, None]

    def dense(v, w, b):
        return lrelu(jnp.dot(v, w.T, precision=HI) + b)[:, None, :]

    x = csa[:, None, :].astype(jnp.float32)
    x = lrelu(conv1d(x, p["csa1_w"], p["csa1_b"], 2))
    x = lrelu(conv1d(x, p["csa2_w"], p["csa2_b"], 1))
    x = lrelu(conv1d(x, p["csa3_w"], p["csa3_b"], 2))             # (B, 1, 21)

    z = jnp.concatenate([x,
                         dense(diagnosis, p["emb_w"], p["emb_b"]),
                         dense(spirometry_label, p["spiro_w"], p["spiro_b"]),
                         dense(demographic, p["demo_w"], p["demo_b"])], axis=1)

    z = lrelu(bn(conv1d(z, p["cls1_w"], p["cls1_b"], 2), p["bn1_g"], p["bn1_b"]))
    z = lrelu(bn(conv1d(z, p["cls2_w"], p["cls2_b"], 2), p["bn2_g"], p["bn2_b"]))
    z = lrelu(bn(conv1d(z, p["cls3_w"], p["cls3_b"], 2), p["bn3_g"], p["bn3_b"]))

    z = z.reshape(z.shape[0], -1)                                 # Flatten, index = c*3 + l
    z = jnp.maximum(jnp.dot(z, p["fc1_w"].T, precision=HI) + p["fc1_b"], 0.0)
    z = jnp.maximum(jnp.dot(z, p["fc2_w"].T, precision=HI) + p["fc2_b"], 0.0)
    return jnp.clip(z, 0.0, 1.0)                                  # (B, 1)


if __name__ == "__main__":
    root = jax.random.PRNGKey(0)
    kp, k1, k2, k3, k4 = jax.random.split(root, 5)
    params = init_params(kp)

    B = 2
    packed = prepare_params(params, B)     # one-time packing, outside the jit

    csa = jax.random.normal(k1, (B, _CSA_LEN), jnp.float32)
    diagnosis = jax.random.normal(k2, (B, 1), jnp.float32)
    spirometry_label = jax.random.normal(k3, (B, 2), jnp.float32)
    demographic = jax.random.normal(k4, (B, 1), jnp.float32)

    fwd = jax.jit(make_forward(B))
    latent = fwd(packed, csa, diagnosis, spirometry_label, demographic)
    jax.block_until_ready(latent)

    ref = reference_forward(params, csa, diagnosis, spirometry_label, demographic)

    assert latent.shape == (B, 1) and latent.dtype == jnp.float32
    assert bool(jnp.all(jnp.isfinite(latent)))
    assert bool(jnp.allclose(latent, ref, atol=2e-3, rtol=2e-2)), (latent, ref)
    print("KERNEL_OK")
</pallas_src>

<mosaic_0001>
module attributes {stable_mosaic.version = 11 : i64} {
  func.func @_disc_fused_kernel(%arg0: memref<1x172xf32, #tpu.memory_space<vmem>>, %arg1: memref<4x2xf32, #tpu.memory_space<vmem>>, %arg2: memref<16x3xf32, #tpu.memory_space<vmem>>, %arg3: memref<16x1xf32, #tpu.memory_space<vmem>>, %arg4: memref<16x48xf32, #tpu.memory_space<vmem>>, %arg5: memref<16x1xf32, #tpu.memory_space<vmem>>, %arg6: memref<1x48xf32, #tpu.memory_space<vmem>>, %arg7: memref<1x1xf32, #tpu.memory_space<vmem>>, %arg8: memref<172x88xf32, #tpu.memory_space<vmem>>, %arg9: memref<88x46xf32, #tpu.memory_space<vmem>>, %arg10: memref<46x26xf32, #tpu.memory_space<vmem>>, %arg11: memref<26x16xf32, #tpu.memory_space<vmem>>, %arg12: memref<16x6xf32, #tpu.memory_space<vmem>>, %arg13: memref<1x88xf32, #tpu.memory_space<vmem>>, %arg14: memref<1x46xf32, #tpu.memory_space<vmem>>, %arg15: memref<1x26xf32, #tpu.memory_space<vmem>>, %arg16: memref<1x16xf32, #tpu.memory_space<vmem>>, %arg17: memref<2x46xf32, #tpu.memory_space<vmem>>, %arg18: memref<7x46xf32, #tpu.memory_space<vmem>>, %arg19: memref<16x12xf32, #tpu.memory_space<vmem>>, %arg20: memref<32x48xf32, #tpu.memory_space<vmem>>, %arg21: memref<16x96xf32, #tpu.memory_space<vmem>>, %arg22: memref<16x2xf32, #tpu.memory_space<vmem>>, %arg23: memref<32x2xf32, #tpu.memory_space<vmem>>, %arg24: memref<16x2xf32, #tpu.memory_space<vmem>>, %arg25: memref<24x48xf32, #tpu.memory_space<vmem>>, %arg26: memref<24x1xf32, #tpu.memory_space<vmem>>, %arg27: memref<1x24xf32, #tpu.memory_space<vmem>>, %arg28: memref<1x1xf32, #tpu.memory_space<vmem>>, %arg29: memref<1x2xf32, #tpu.memory_space<vmem>>) attributes {dimension_semantics = [], scalar_prefetch = 0 : i64, scratch_operands = 0 : i64, tpu.core_type = #tpu.core_type<tc>} {
    %c0 = arith.constant 0 : index
    %c0_0 = arith.constant 0 : index
    %0 = vector.load %arg13[%c0, %c0_0] : memref<1x88xf32, #tpu.memory_space<vmem>>, vector<1x88xf32>
    %c0_1 = arith.constant 0 : index
    %c0_2 = arith.constant 0 : index
    %1 = vector.load %arg14[%c0_1, %c0_2] : memref<1x46xf32, #tpu.memory_space<vmem>>, vector<1x46xf32>
    %c0_3 = arith.constant 0 : index
    %c0_4 = arith.constant 0 : index
    %2 = vector.load %arg0[%c0_3, %c0_4] : memref<1x172xf32, #tpu.memory_space<vmem>>, vector<1x172xf32>
    %c0_5 = arith.constant 0 : index
    %c0_6 = arith.constant 0 : index
    %3 = vector.load %arg2[%c0_5, %c0_6] : memref<16x3xf32, #tpu.memory_space<vmem>>, vector<16x3xf32>
    %4 = vector.extract_strided_slice %2 {offsets = [0, 1], sizes = [1, 171], strides = [1, 1]} : vector<1x172xf32> to vector<1x171xf32>
    %cst = arith.constant 0.000000e+00 : f32
    %5 = vector.broadcast %cst : f32 to vector<1x1xf32>
    %6 = tpu.concatenate %4, %5 in 1 : vector<1x171xf32>, vector<1x1xf32> -> vector<1x172xf32>
    %7 = vector.extract_strided_slice %2 {offsets = [0, 2], sizes = [1, 170], strides = [1, 1]} : vector<1x172xf32> to vector<1x170xf32>
    %cst_7 = arith.constant 0.000000e+00 : f32
    %8 = vector.broadcast %cst_7 : f32 to vector<1x2xf32>
    %9 = tpu.concatenate %7, %8 in 1 : vector<1x170xf32>, vector<1x2xf32> -> vector<1x172xf32>
    %10 = tpu.concatenate %2, %6, %9 in 0 : vector<1x172xf32>, vector<1x172xf32>, vector<1x172xf32> -> vector<3x172xf32>
    %cst_8 = arith.constant dense<0.000000e+00> : vector<16x172xf32>
    %11 = tpu.matmul %3, %10, %cst_8 {dimension_numbers = #tpu.dot_dimension_numbers<[1], [0], [0], [1], [0, 0, 1, 1], [], []>} : vector<16x3xf32>, vector<3x172xf32>, vector<16x172xf32> -> vector<16x172xf32>
    %c0_9 = arith.constant 0 : index
    %c0_10 = arith.constant 0 : index
    %12 = vector.load %arg8[%c0_9, %c0_10] : memref<172x88xf32, #tpu.memory_space<vmem>>, vector<172x88xf32>
    %cst_11 = arith.constant dense<0.000000e+00> : vector<16x88xf32>
    %13 = tpu.matmul %11, %12, %cst_11 {dimension_numbers = #tpu.dot_dimension_numbers<[1], [0], [0], [1], [0, 0, 1, 1], [], []>} : vector<16x172xf32>, vector<172x88xf32>, vector<16x88xf32> -> vector<16x88xf32>
    %c0_12 = arith.constant 0 : index
    %c0_13 = arith.constant 0 : index
    %14 = vector.load %arg3[%c0_12, %c0_13] : memref<16x1xf32, #tpu.memory_space<vmem>>, vector<16x1xf32>
    %15 = vector.broadcast %14 : vector<16x1xf32> to vector<16x88xf32>
    %16 = arith.addf %13, %15 : vector<16x88xf32>
    %cst_14 = arith.constant 2.000000e-01 : f32
    %17 = vector.broadcast %cst_14 : f32 to vector<16x88xf32>
    %18 = arith.mulf %17, %16 : vector<16x88xf32>
    %19 = arith.maximumf %16, %18 : vector<16x88xf32>
    %20 = vector.broadcast %0 : vector<1x88xf32> to vector<16x88xf32>
    %21 = arith.mulf %19, %20 : vector<16x88xf32>
    %c0_15 = arith.constant 0 : index
    %c0_16 = arith.constant 0 : index
    %22 = vector.load %arg4[%c0_15, %c0_16] : memref<16x48xf32, #tpu.memory_space<vmem>>, vector<16x48xf32>
    %23 = vector.extract_strided_slice %21 {offsets = [0, 1], sizes = [16, 87], strides = [1, 1]} : vector<16x88xf32> to vector<16x87xf32>
    %cst_17 = arith.constant 0.000000e+00 : f32
    %24 = vector.broadcast %cst_17 : f32 to vector<16x1xf32>
    %25 = tpu.concatenate %23, %24 in 1 : vector<16x87xf32>, vector<16x1xf32> -> vector<16x88xf32>
    %26 = vector.extract_strided_slice %21 {offsets = [0, 2], sizes = [16, 86], strides = [1, 1]} : vector<16x88xf32> to vector<16x86xf32>
    %cst_18 = arith.constant 0.000000e+00 : f32
    %27 = vector.broadcast %cst_18 : f32 to vector<16x2xf32>
    %28 = tpu.concatenate %26, %27 in 1 : vector<16x86xf32>, vector<16x2xf32> -> vector<16x88xf32>
    %29 = tpu.concatenate %21, %25, %28 in 0 : vector<16x88xf32>, vector<16x88xf32>, vector<16x88xf32> -> vector<48x88xf32>
    %cst_19 = arith.constant dense<0.000000e+00> : vector<16x88xf32>
    %30 = tpu.matmul %22, %29, %cst_19 {dimension_numbers = #tpu.dot_dimension_numbers<[1], [0], [0], [1], [0, 0, 1, 1], [], []>} : vector<16x48xf32>, vector<48x88xf32>, vector<16x88xf32> -> vector<16x88xf32>
    %cst_20 = arith.constant 0.000000e+00 : f32
    %31 = vector.broadcast %cst_20 : f32 to vector<16x1xf32>
    %32 = vector.extract_strided_slice %30 {offsets = [0, 0], sizes = [16, 87], strides = [1, 1]} : vector<16x88xf32> to vector<16x87xf32>
    %33 = tpu.concatenate %31, %32 in 1 : vector<16x1xf32>, vector<16x87xf32> -> vector<16x88xf32>
    %c0_21 = arith.constant 0 : index
    %c0_22 = arith.constant 0 : index
    %34 = vector.load %arg5[%c0_21, %c0_22] : memref<16x1xf32, #tpu.memory_space<vmem>>, vector<16x1xf32>
    %35 = vector.broadcast %34 : vector<16x1xf32> to vector<16x88xf32>
    %36 = arith.addf %33, %35 : vector<16x88xf32>
    %cst_23 = arith.constant 2.000000e-01 : f32
    %37 = vector.broadcast %cst_23 : f32 to vector<16x88xf32>
    %38 = arith.mulf %37, %36 : vector<16x88xf32>
    %39 = arith.maximumf %36, %38 : vector<16x88xf32>
    %40 = vector.broadcast %0 : vector<1x88xf32> to vector<16x88xf32>
    %41 = arith.mulf %39, %40 : vector<16x88xf32>
    %c0_24 = arith.constant 0 : index
    %c0_25 = arith.constant 0 : index
    %42 = vector.load %arg6[%c0_24, %c0_25] : memref<1x48xf32, #tpu.memory_space<vmem>>, vector<1x48xf32>
    %43 = vector.extract_strided_slice %41 {offsets = [0, 1], sizes = [16, 87], strides = [1, 1]} : vector<16x88xf32> to vector<16x87xf32>
    %cst_26 = arith.constant 0.000000e+00 : f32
    %44 = vector.broadcast %cst_26 : f32 to vector<16x1xf32>
    %45 = tpu.concatenate %43, %44 in 1 : vector<16x87xf32>, vector<16x1xf32> -> vector<16x88xf32>
    %46 = vector.extract_strided_slice %41 {offsets = [0, 2], sizes = [16, 86], strides = [1, 1]} : vector<16x88xf32> to vector<16x86xf32>
    %cst_27 = arith.constant 0.000000e+00 : f32
    %47 = vector.broadcast %cst_27 : f32 to vector<16x2xf32>
    %48 = tpu.concatenate %46, %47 in 1 : vector<16x86xf32>, vector<16x2xf32> -> vector<16x88xf32>
    %49 = tpu.concatenate %41, %45, %48 in 0 : vector<16x88xf32>, vector<16x88xf32>, vector<16x88xf32> -> vector<48x88xf32>
    %cst_28 = arith.constant dense<0.000000e+00> : vector<1x88xf32>
    %50 = tpu.matmul %42, %49, %cst_28 {dimension_numbers = #tpu.dot_dimension_numbers<[1], [0], [0], [1], [0, 0, 1, 1], [], []>} : vector<1x48xf32>, vector<48x88xf32>, vector<1x88xf32> -> vector<1x88xf32>
    %c0_29 = arith.constant 0 : index
    %c0_30 = arith.constant 0 : index
    %51 = vector.load %arg9[%c0_29, %c0_30] : memref<88x46xf32, #tpu.memory_space<vmem>>, vector<88x46xf32>
    %cst_31 = arith.constant dense<0.000000e+00> : vector<1x46xf32>
    %52 = tpu.matmul %50, %51, %cst_31 {dimension_numbers = #tpu.dot_dimension_numbers<[1], [0], [0], [1], [0, 0, 1, 1], [], []>} : vector<1x88xf32>, vector<88x46xf32>, vector<1x46xf32> -> vector<1x46xf32>
    %c0_32 = arith.constant 0 : index
    %c0_33 = arith.constant 0 : index
    %53 = vector.load %arg7[%c0_32, %c0_33] : memref<1x1xf32, #tpu.memory_space<vmem>>, vector<1x1xf32>
    %54 = vector.broadcast %53 : vector<1x1xf32> to vector<1x46xf32>
    %55 = arith.addf %52, %54 : vector<1x46xf32>
    %cst_34 = arith.constant 2.000000e-01 : f32
    %56 = vector.broadcast %cst_34 : f32 to vector<1x46xf32>
    %57 = arith.mulf %56, %55 : vector<1x46xf32>
    %58 = arith.maximumf %55, %57 : vector<1x46xf32>
    %59 = arith.mulf %58, %1 : vector<1x46xf32>
    %c0_35 = arith.constant 0 : index
    %c0_36 = arith.constant 0 : index
    %60 = vector.load %arg1[%c0_35, %c0_36] : memref<4x2xf32, #tpu.memory_space<vmem>>, vector<4x2xf32>
    %c0_37 = arith.constant 0 : index
    %c0_38 = arith.constant 0 : index
    %61 = vector.load %arg17[%c0_37, %c0_38] : memref<2x46xf32, #tpu.memory_space<vmem>>, vector<2x46xf32>
    %cst_39 = arith.constant dense<0.000000e+00> : vector<4x46xf32>
    %62 = tpu.matmul %60, %61, %cst_39 {dimension_numbers = #tpu.dot_dimension_numbers<[1], [0], [0], [1], [0, 0, 1, 1], [], []>} : vector<4x2xf32>, vector<2x46xf32>, vector<4x46xf32> -> vector<4x46xf32>
    %c0_40 = arith.constant 0 : index
    %c0_41 = arith.constant 0 : index
    %63 = vector.load %arg18[%c0_40, %c0_41] : memref<7x46xf32, #tpu.memory_space<vmem>>, vector<7x46xf32>
    %64 = vector.extract_strided_slice %62 {offsets = [0, 0], sizes = [1, 46], strides = [1, 1]} : vector<4x46xf32> to vector<1x46xf32>
    %65 = vector.extract_strided_slice %63 {offsets = [0, 0], sizes = [1, 46], strides = [1, 1]} : vector<7x46xf32> to vector<1x46xf32>
    %66 = arith.mulf %64, %65 : vector<1x46xf32>
    %67 = vector.extract_strided_slice %63 {offsets = [4, 0], sizes = [1, 46], strides = [1, 1]} : vector<7x46xf32> to vector<1x46xf32>
    %68 = arith.addf %66, %67 : vector<1x46xf32>
    %cst_42 = arith.constant 2.000000e-01 : f32
    %69 = vector.broadcast %cst_42 : f32 to vector<1x46xf32>
    %70 = arith.mulf %69, %68 : vector<1x46xf32>
    %71 = arith.maximumf %68, %70 : vector<1x46xf32>
    %72 = vector.extract_strided_slice %62 {offsets = [1, 0], sizes = [1, 46], strides = [1, 1]} : vector<4x46xf32> to vector<1x46xf32>
    %73 = vector.extract_strided_slice %63 {offsets = [1, 0], sizes = [1, 46], strides = [1, 1]} : vector<7x46xf32> to vector<1x46xf32>
    %74 = arith.mulf %72, %73 : vector<1x46xf32>
    %75 = vector.extract_strided_slice %62 {offsets = [2, 0], sizes = [1, 46], strides = [1, 1]} : vector<4x46xf32> to vector<1x46xf32>
    %76 = vector.extract_strided_slice %63 {offsets = [2, 0], sizes = [1, 46], strides = [1, 1]} : vector<7x46xf32> to vector<1x46xf32>
    %77 = arith.mulf %75, %76 : vector<1x46xf32>
    %78 = arith.addf %74, %77 : vector<1x46xf32>
    %79 = vector.extract_strided_slice %63 {offsets = [5, 0], sizes = [1, 46], strides = [1, 1]} : vector<7x46xf32> to vector<1x46xf32>
    %80 = arith.addf %78, %79 : vector<1x46xf32>
    %cst_43 = arith.constant 2.000000e-01 : f32
    %81 = vector.broadcast %cst_43 : f32 to vector<1x46xf32>
    %82 = arith.mulf %81, %80 : vector<1x46xf32>
    %83 = arith.maximumf %80, %82 : vector<1x46xf32>
    %84 = vector.extract_strided_slice %62 {offsets = [3, 0], sizes = [1, 46], strides = [1, 1]} : vector<4x46xf32> to vector<1x46xf32>
    %85 = vector.extract_strided_slice %63 {offsets = [3, 0], sizes = [1, 46], strides = [1, 1]} : vector<7x46xf32> to vector<1x46xf32>
    %86 = arith.mulf %84, %85 : vector<1x46xf32>
    %87 = vector.extract_strided_slice %63 {offsets = [6, 0], sizes = [1, 46], strides = [1, 1]} : vector<7x46xf32> to vector<1x46xf32>
    %88 = arith.addf %86, %87 : vector<1x46xf32>
    %cst_44 = arith.constant 2.000000e-01 : f32
    %89 = vector.broadcast %cst_44 : f32 to vector<1x46xf32>
    %90 = arith.mulf %89, %88 : vector<1x46xf32>
    %91 = arith.maximumf %88, %90 : vector<1x46xf32>
    %92 = tpu.concatenate %59, %71, %83, %91 in 0 : vector<1x46xf32>, vector<1x46xf32>, vector<1x46xf32>, vector<1x46xf32> -> vector<4x46xf32>
    %c0_45 = arith.constant 0 : index
    %c0_46 = arith.constant 0 : index
    %93 = vector.load %arg19[%c0_45, %c0_46] : memref<16x12xf32, #tpu.memory_space<vmem>>, vector<16x12xf32>
    %94 = vector.extract_strided_slice %92 {offsets = [0, 1], sizes = [4, 45], strides = [1, 1]} : vector<4x46xf32> to vector<4x45xf32>
    %cst_47 = arith.constant 0.000000e+00 : f32
    %95 = vector.broadcast %cst_47 : f32 to vector<4x1xf32>
    %96 = tpu.concatenate %94, %95 in 1 : vector<4x45xf32>, vector<4x1xf32> -> vector<4x46xf32>
    %97 = vector.extract_strided_slice %92 {offsets = [0, 2], sizes = [4, 44], strides = [1, 1]} : vector<4x46xf32> to vector<4x44xf32>
    %cst_48 = arith.constant 0.000000e+00 : f32
    %98 = vector.broadcast %cst_48 : f32 to vector<4x2xf32>
    %99 = tpu.concatenate %97, %98 in 1 : vector<4x44xf32>, vector<4x2xf32> -> vector<4x46xf32>
    %100 = tpu.concatenate %92, %96, %99 in 0 : vector<4x46xf32>, vector<4x46xf32>, vector<4x46xf32> -> vector<12x46xf32>
    %cst_49 = arith.constant dense<0.000000e+00> : vector<16x46xf32>
    %101 = tpu.matmul %93, %100, %cst_49 {dimension_numbers = #tpu.dot_dimension_numbers<[1], [0], [0], [1], [0, 0, 1, 1], [], []>} : vector<16x12xf32>, vector<12x46xf32>, vector<16x46xf32> -> vector<16x46xf32>
    %c0_50 = arith.constant 0 : index
    %c0_51 = arith.constant 0 : index
    %102 = vector.load %arg10[%c0_50, %c0_51] : memref<46x26xf32, #tpu.memory_space<vmem>>, vector<46x26xf32>
    %cst_52 = arith.constant dense<0.000000e+00> : vector<16x26xf32>
    %103 = tpu.matmul %101, %102, %cst_52 {dimension_numbers = #tpu.dot_dimension_numbers<[1], [0], [0], [1], [0, 0, 1, 1], [], []>} : vector<16x46xf32>, vector<46x26xf32>, vector<16x26xf32> -> vector<16x26xf32>
    %c0_53 = arith.constant 0 : index
    %c0_54 = arith.constant 0 : index
    %104 = vector.load %arg15[%c0_53, %c0_54] : memref<1x26xf32, #tpu.memory_space<vmem>>, vector<1x26xf32>
    %cst_55 = arith.constant dense<0.000000e+00> : vector<16xf32>
    %105 = vector.multi_reduction <add>, %103, %cst_55 [1] : vector<16x26xf32> to vector<16xf32>
    %106 = vector.shape_cast %105 : vector<16xf32> to vector<16x1xf32>
    %cst_56 = arith.constant 0.0454545468 : f32
    %107 = vector.broadcast %cst_56 : f32 to vector<16x1xf32>
    %108 = arith.mulf %106, %107 : vector<16x1xf32>
    %109 = vector.broadcast %108 : vector<16x1xf32> to vector<16x26xf32>
    %110 = arith.subf %103, %109 : vector<16x26xf32>
    %111 = vector.broadcast %104 : vector<1x26xf32> to vector<16x26xf32>
    %112 = arith.mulf %110, %111 : vector<16x26xf32>
    %113 = arith.mulf %112, %112 : vector<16x26xf32>
    %cst_57 = arith.constant dense<0.000000e+00> : vector<16xf32>
    %114 = vector.multi_reduction <add>, %113, %cst_57 [1] : vector<16x26xf32> to vector<16xf32>
    %115 = vector.shape_cast %114 : vector<16xf32> to vector<16x1xf32>
    %cst_58 = arith.constant 0.0454545468 : f32
    %116 = vector.broadcast %cst_58 : f32 to vector<16x1xf32>
    %117 = arith.mulf %115, %116 : vector<16x1xf32>
    %cst_59 = arith.constant 9.99999974E-6 : f32
    %118 = vector.broadcast %cst_59 : f32 to vector<16x1xf32>
    %119 = arith.addf %117, %118 : vector<16x1xf32>
    %120 = math.rsqrt %119 : vector<16x1xf32>
    %c0_60 = arith.constant 0 : index
    %c0_61 = arith.constant 0 : index
    %121 = vector.load %arg22[%c0_60, %c0_61] : memref<16x2xf32, #tpu.memory_space<vmem>>, vector<16x1xf32>
    %122 = arith.mulf %120, %121 : vector<16x1xf32>
    %123 = vector.broadcast %122 : vector<16x1xf32> to vector<16x26xf32>
    %124 = arith.mulf %112, %123 : vector<16x26xf32>
    %c0_62 = arith.constant 0 : index
    %c1 = arith.constant 1 : index
    %125 = vector.load %arg22[%c0_62, %c1] : memref<16x2xf32, #tpu.memory_space<vmem>>, vector<16x1xf32>
    %126 = vector.broadcast %125 : vector<16x1xf32> to vector<16x26xf32>
    %127 = arith.addf %124, %126 : vector<16x26xf32>
    %cst_63 = arith.constant 2.000000e-01 : f32
    %128 = vector.broadcast %cst_63 : f32 to vector<16x26xf32>
    %129 = arith.mulf %128, %127 : vector<16x26xf32>
    %130 = arith.maximumf %127, %129 : vector<16x26xf32>
    %131 = vector.broadcast %104 : vector<1x26xf32> to vector<16x26xf32>
    %132 = arith.mulf %130, %131 : vector<16x26xf32>
    %c0_64 = arith.constant 0 : index
    %c0_65 = arith.constant 0 : index
    %133 = vector.load %arg20[%c0_64, %c0_65] : memref<32x48xf32, #tpu.memory_space<vmem>>, vector<32x48xf32>
    %134 = vector.extract_strided_slice %132 {offsets = [0, 1], sizes = [16, 25], strides = [1, 1]} : vector<16x26xf32> to vector<16x25xf32>
    %cst_66 = arith.constant 0.000000e+00 : f32
    %135 = vector.broadcast %cst_66 : f32 to vector<16x1xf32>
    %136 = tpu.concatenate %134, %135 in 1 : vector<16x25xf32>, vector<16x1xf32> -> vector<16x26xf32>
    %137 = vector.extract_strided_slice %132 {offsets = [0, 2], sizes = [16, 24], strides = [1, 1]} : vector<16x26xf32> to vector<16x24xf32>
    %cst_67 = arith.constant 0.000000e+00 : f32
    %138 = vector.broadcast %cst_67 : f32 to vector<16x2xf32>
    %139 = tpu.concatenate %137, %138 in 1 : vector<16x24xf32>, vector<16x2xf32> -> vector<16x26xf32>
    %140 = tpu.concatenate %132, %136, %139 in 0 : vector<16x26xf32>, vector<16x26xf32>, vector<16x26xf32> -> vector<48x26xf32>
    %cst_68 = arith.constant dense<0.000000e+00> : vector<32x26xf32>
    %141 = tpu.matmul %133, %140, %cst_68 {dimension_numbers = #tpu.dot_dimension_numbers<[1], [0], [0], [1], [0, 0, 1, 1], [], []>} : vector<32x48xf32>, vector<48x26xf32>, vector<32x26xf32> -> vector<32x26xf32>
    %c0_69 = arith.constant 0 : index
    %c0_70 = arith.constant 0 : index
    %142 = vector.load %arg11[%c0_69, %c0_70] : memref<26x16xf32, #tpu.memory_space<vmem>>, vector<26x16xf32>
    %cst_71 = arith.constant dense<0.000000e+00> : vector<32x16xf32>
    %143 = tpu.matmul %141, %142, %cst_71 {dimension_numbers = #tpu.dot_dimension_numbers<[1], [0], [0], [1], [0, 0, 1, 1], [], []>} : vector<32x26xf32>, vector<26x16xf32>, vector<32x16xf32> -> vector<32x16xf32>
    %c0_72 = arith.constant 0 : index
    %c0_73 = arith.constant 0 : index
    %144 = vector.load %arg16[%c0_72, %c0_73] : memref<1x16xf32, #tpu.memory_space<vmem>>, vector<1x16xf32>
    %cst_74 = arith.constant dense<0.000000e+00> : vector<32xf32>
    %145 = vector.multi_reduction <add>, %143, %cst_74 [1] : vector<32x16xf32> to vector<32xf32>
    %146 = vector.shape_cast %145 : vector<32xf32> to vector<32x1xf32>
    %cst_75 = arith.constant 0.0833333358 : f32
    %147 = vector.broadcast %cst_75 : f32 to vector<32x1xf32>
    %148 = arith.mulf %146, %147 : vector<32x1xf32>
    %149 = vector.broadcast %148 : vector<32x1xf32> to vector<32x16xf32>
    %150 = arith.subf %143, %149 : vector<32x16xf32>
    %151 = vector.broadcast %144 : vector<1x16xf32> to vector<32x16xf32>
    %152 = arith.mulf %150, %151 : vector<32x16xf32>
    %153 = arith.mulf %152, %152 : vector<32x16xf32>
    %cst_76 = arith.constant dense<0.000000e+00> : vector<32xf32>
    %154 = vector.multi_reduction <add>, %153, %cst_76 [1] : vector<32x16xf32> to vector<32xf32>
    %155 = vector.shape_cast %154 : vector<32xf32> to vector<32x1xf32>
    %cst_77 = arith.constant 0.0833333358 : f32
    %156 = vector.broadcast %cst_77 : f32 to vector<32x1xf32>
    %157 = arith.mulf %155, %156 : vector<32x1xf32>
    %cst_78 = arith.constant 9.99999974E-6 : f32
    %158 = vector.broadcast %cst_78 : f32 to vector<32x1xf32>
    %159 = arith.addf %157, %158 : vector<32x1xf32>
    %160 = math.rsqrt %159 : vector<32x1xf32>
    %c0_79 = arith.constant 0 : index
    %c0_80 = arith.constant 0 : index
    %161 = vector.load %arg23[%c0_79, %c0_80] : memref<32x2xf32, #tpu.memory_space<vmem>>, vector<32x1xf32>
    %162 = arith.mulf %160, %161 : vector<32x1xf32>
    %163 = vector.broadcast %162 : vector<32x1xf32> to vector<32x16xf32>
    %164 = arith.mulf %152, %163 : vector<32x16xf32>
    %c0_81 = arith.constant 0 : index
    %c1_82 = arith.constant 1 : index
    %165 = vector.load %arg23[%c0_81, %c1_82] : memref<32x2xf32, #tpu.memory_space<vmem>>, vector<32x1xf32>
    %166 = vector.broadcast %165 : vector<32x1xf32> to vector<32x16xf32>
    %167 = arith.addf %164, %166 : vector<32x16xf32>
    %cst_83 = arith.constant 2.000000e-01 : f32
    %168 = vector.broadcast %cst_83 : f32 to vector<32x16xf32>
    %169 = arith.mulf %168, %167 : vector<32x16xf32>
    %170 = arith.maximumf %167, %169 : vector<32x16xf32>
    %171 = vector.broadcast %144 : vector<1x16xf32> to vector<32x16xf32>
    %172 = arith.mulf %170, %171 : vector<32x16xf32>
    %c0_84 = arith.constant 0 : index
    %c0_85 = arith.constant 0 : index
    %173 = vector.load %arg21[%c0_84, %c0_85] : memref<16x96xf32, #tpu.memory_space<vmem>>, vector<16x96xf32>
    %174 = vector.extract_strided_slice %172 {offsets = [0, 1], sizes = [32, 15], strides = [1, 1]} : vector<32x16xf32> to vector<32x15xf32>
    %cst_86 = arith.constant 0.000000e+00 : f32
    %175 = vector.broadcast %cst_86 : f32 to vector<32x1xf32>
    %176 = tpu.concatenate %174, %175 in 1 : vector<32x15xf32>, vector<32x1xf32> -> vector<32x16xf32>
    %177 = vector.extract_strided_slice %172 {offsets = [0, 2], sizes = [32, 14], strides = [1, 1]} : vector<32x16xf32> to vector<32x14xf32>
    %cst_87 = arith.constant 0.000000e+00 : f32
    %178 = vector.broadcast %cst_87 : f32 to vector<32x2xf32>
    %179 = tpu.concatenate %177, %178 in 1 : vector<32x14xf32>, vector<32x2xf32> -> vector<32x16xf32>
    %180 = tpu.concatenate %172, %176, %179 in 0 : vector<32x16xf32>, vector<32x16xf32>, vector<32x16xf32> -> vector<96x16xf32>
    %cst_88 = arith.constant dense<0.000000e+00> : vector<16x16xf32>
    %181 = tpu.matmul %173, %180, %cst_88 {dimension_numbers = #tpu.dot_dimension_numbers<[1], [0], [0], [1], [0, 0, 1, 1], [], []>} : vector<16x96xf32>, vector<96x16xf32>, vector<16x16xf32> -> vector<16x16xf32>
    %c0_89 = arith.constant 0 : index
    %c0_90 = arith.constant 0 : index
    %182 = vector.load %arg12[%c0_89, %c0_90] : memref<16x6xf32, #tpu.memory_space<vmem>>, vector<16x6xf32>
    %cst_91 = arith.constant dense<0.000000e+00> : vector<16x6xf32>
    %183 = tpu.matmul %181, %182, %cst_91 {dimension_numbers = #tpu.dot_dimension_numbers<[1], [0], [0], [1], [0, 0, 1, 1], [], []>} : vector<16x16xf32>, vector<16x6xf32>, vector<16x6xf32> -> vector<16x6xf32>
    %cst_92 = arith.constant dense<0.000000e+00> : vector<16xf32>
    %184 = vector.multi_reduction <add>, %183, %cst_92 [1] : vector<16x6xf32> to vector<16xf32>
    %185 = vector.shape_cast %184 : vector<16xf32> to vector<16x1xf32>
    %cst_93 = arith.constant 0.166666672 : f32
    %186 = vector.broadcast %cst_93 : f32 to vector<16x1xf32>
    %187 = arith.mulf %185, %186 : vector<16x1xf32>
    %188 = vector.broadcast %187 : vector<16x1xf32> to vector<16x6xf32>
    %189 = arith.subf %183, %188 : vector<16x6xf32>
    %190 = arith.mulf %189, %189 : vector<16x6xf32>
    %cst_94 = arith.constant dense<0.000000e+00> : vector<16xf32>
    %191 = vector.multi_reduction <add>, %190, %cst_94 [1] : vector<16x6xf32> to vector<16xf32>
    %192 = vector.shape_cast %191 : vector<16xf32> to vector<16x1xf32>
    %cst_95 = arith.constant 0.166666672 : f32
    %193 = vector.broadcast %cst_95 : f32 to vector<16x1xf32>
    %194 = arith.mulf %192, %193 : vector<16x1xf32>
    %cst_96 = arith.constant 9.99999974E-6 : f32
    %195 = vector.broadcast %cst_96 : f32 to vector<16x1xf32>
    %196 = arith.addf %194, %195 : vector<16x1xf32>
    %197 = math.rsqrt %196 : vector<16x1xf32>
    %c0_97 = arith.constant 0 : index
    %c0_98 = arith.constant 0 : index
    %198 = vector.load %arg24[%c0_97, %c0_98] : memref<16x2xf32, #tpu.memory_space<vmem>>, vector<16x1xf32>
    %199 = arith.mulf %197, %198 : vector<16x1xf32>
    %200 = vector.broadcast %199 : vector<16x1xf32> to vector<16x6xf32>
    %201 = arith.mulf %189, %200 : vector<16x6xf32>
    %c0_99 = arith.constant 0 : index
    %c1_100 = arith.constant 1 : index
    %202 = vector.load %arg24[%c0_99, %c1_100] : memref<16x2xf32, #tpu.memory_space<vmem>>, vector<16x1xf32>
    %203 = vector.broadcast %202 : vector<16x1xf32> to vector<16x6xf32>
    %204 = arith.addf %201, %203 : vector<16x6xf32>
    %cst_101 = arith.constant 2.000000e-01 : f32
    %205 = vector.broadcast %cst_101 : f32 to vector<16x6xf32>
    %206 = arith.mulf %205, %204 : vector<16x6xf32>
    %207 = arith.maximumf %204, %206 : vector<16x6xf32>
    %208 = vector.extract_strided_slice %207 {offsets = [0, 0], sizes = [16, 2], strides = [1, 1]} : vector<16x6xf32> to vector<16x2xf32>
    %209 = vector.extract_strided_slice %207 {offsets = [0, 2], sizes = [16, 2], strides = [1, 1]} : vector<16x6xf32> to vector<16x2xf32>
    %210 = vector.extract_strided_slice %207 {offsets = [0, 4], sizes = [16, 2], strides = [1, 1]} : vector<16x6xf32> to vector<16x2xf32>
    %211 = tpu.concatenate %208, %209, %210 in 0 : vector<16x2xf32>, vector<16x2xf32>, vector<16x2xf32> -> vector<48x2xf32>
    %c0_102 = arith.constant 0 : index
    %c0_103 = arith.constant 0 : index
    %212 = vector.load %arg25[%c0_102, %c0_103] : memref<24x48xf32, #tpu.memory_space<vmem>>, vector<24x48xf32>
    %cst_104 = arith.constant dense<0.000000e+00> : vector<24x2xf32>
    %213 = tpu.matmul %212, %211, %cst_104 {dimension_numbers = #tpu.dot_dimension_numbers<[1], [0], [0], [1], [0, 0, 1, 1], [], []>} : vector<24x48xf32>, vector<48x2xf32>, vector<24x2xf32> -> vector<24x2xf32>
    %c0_105 = arith.constant 0 : index
    %c0_106 = arith.constant 0 : index
    %214 = vector.load %arg26[%c0_105, %c0_106] : memref<24x1xf32, #tpu.memory_space<vmem>>, vector<24x1xf32>
    %215 = vector.broadcast %214 : vector<24x1xf32> to vector<24x2xf32>
    %216 = arith.addf %213, %215 : vector<24x2xf32>
    %cst_107 = arith.constant 0.000000e+00 : f32
    %217 = vector.broadcast %cst_107 : f32 to vector<24x2xf32>
    %218 = arith.maximumf %216, %217 : vector<24x2xf32>
    %c0_108 = arith.constant 0 : index
    %c0_109 = arith.constant 0 : index
    %219 = vector.load %arg27[%c0_108, %c0_109] : memref<1x24xf32, #tpu.memory_space<vmem>>, vector<1x24xf32>
    %cst_110 = arith.constant dense<0.000000e+00> : vector<1x2xf32>
    %220 = tpu.matmul %219, %218, %cst_110 {dimension_numbers = #tpu.dot_dimension_numbers<[1], [0], [0], [1], [0, 0, 1, 1], [], []>} : vector<1x24xf32>, vector<24x2xf32>, vector<1x2xf32> -> vector<1x2xf32>
    %c0_111 = arith.constant 0 : index
    %c0_112 = arith.constant 0 : index
    %221 = vector.load %arg28[%c0_111, %c0_112] : memref<1x1xf32, #tpu.memory_space<vmem>>, vector<1x1xf32>
    %222 = vector.broadcast %221 : vector<1x1xf32> to vector<1x2xf32>
    %223 = arith.addf %220, %222 : vector<1x2xf32>
    %cst_113 = arith.constant 0.000000e+00 : f32
    %cst_114 = arith.constant 1.000000e+00 : f32
    %224 = vector.broadcast %cst_113 : f32 to vector<1x2xf32>
    %225 = arith.maximumf %224, %223 : vector<1x2xf32>
    %226 = vector.broadcast %cst_114 : f32 to vector<1x2xf32>
    %227 = arith.minimumf %226, %225 : vector<1x2xf32>
    %c0_115 = arith.constant 0 : index
    %c0_116 = arith.constant 0 : index
    %228 = vector.load %arg29[%c0_115, %c0_116] : memref<1x2xf32, #tpu.memory_space<vmem>>, vector<1x2xf32>
    tpu.vector_store %arg29[%c0_115, %c0_116], %227 {strides = array<i32>} : memref<1x2xf32, #tpu.memory_space<vmem>>, vector<1x2xf32>,
    return
  }
}

</mosaic_0001>

<bundles_post_ra>
// kernel: fwd.1
= control target key start
LH: loop header
LB: loop body
LE: loop exit
PB: predicated region body
PF: predicated region fallthrough
CT: control target
= control target key end

     0   :  { %s1540_s6 = smov 1   ;;  %s1541_s10 = smov 2   ;;  %s1941_s0 = inlined_call_operand.smem [shape: u32[30], index: -1, kind: input, shape index: {}] }
   0x1   :  { %s1587_s5 = sld [smem:[%s1941_s0]]   ;;  %s1542_s14 = smov 3  }
   0x2   :  { %s1592_s9 = sld [smem:[%s1941_s0 + %s1540_s6]]   ;;  %s1543_s18 = smov 4  }
   0x3   :  { %s1597_s13 = sld [smem:[%s1941_s0 + %s1541_s10]]   ;;  %s1544_s22 = smov 5  }
   0x4   :  { %s1602_s17 = sld [smem:[%s1941_s0 + %s1542_s14]]   ;;  %s1545_s26 = smov 6  }
   0x5   :  { %s1607_s21 = sld [smem:[%s1941_s0 + %s1543_s18]]   ;;  %s1546_s30 = smov 7  }
   0x6   :  { %s1612_s25 = sld [smem:[%s1941_s0 + %s1544_s22]]   ;;  %s1547_s4 = smov 8  }
   0x7   :  { %s1617_s29 = sld [smem:[%s1941_s0 + %s1545_s26]]   ;;  %s1548_s10 = smov 9  }
   0x8   :  { %s1328_s3 = sld [smem:[%s1941_s0 + %s1546_s30]]   ;;  %s1549_s15 = smov 10  }
   0x9   :  { %s1625_s8 = sld [smem:[%s1941_s0 + %s1547_s4]]   ;;  %s1550_s20 = smov 11  }
   0xa   :  { %s1630_s14 = sld [smem:[%s1941_s0 + %s1548_s10]]   ;;  %s1551_s26 = smov 12  }
   0xb   :  { %s1635_s19 = sld [smem:[%s1941_s0 + %s1549_s15]]   ;;  %s1552_s1 = smov 13  }
   0xc   :  { %s1640_s24 = sld [smem:[%s1941_s0 + %s1550_s20]]   ;;  %s1553_s7 = smov 14  }
   0xd   :  { %s1645_s30 = sld [smem:[%s1941_s0 + %s1551_s26]]   ;;  %s1554_s15 = smov 15  }
   0xe   :  { %s1650_s6 = sld [smem:[%s1941_s0 + %s1552_s1]]   ;;  %v64_v0 = vstv %s1328_s3  ;;  %s1555_s22 = smov 16  }
   0xf   :  { %s1655_s12 = sld [smem:[%s1941_s0 + %s1553_s7]]   ;;  %65 = vst [vmem:[#allocation2] sm:$0x1] %v64_v0  ;;  %s1556_s3 = smov 17  }
  0x10   :  { %s1660_s20 = sld [smem:[%s1941_s0 + %s1554_s15]]   ;;  %s1557_s4 = smov 18  }
  0x11   :  { %s1665_s27 = sld [smem:[%s1941_s0 + %s1555_s22]]   ;;  %s1558_s15 = smov 19  }
  0x12   :  { %1951 = sst [smem:[#allocation10_spill]] %s1640_s24  ;;  %s1559_s22 = smov 20  }
  0x13   :  { %1952 = sst [smem:[#allocation11_spill]] %s1645_s30 }
  0x14   :  { %s1670_s2 = sld [smem:[%s1941_s0 + %s1556_s3]]   ;;  %s1560_s3 = smov 21  }
  0x15   :  { %s1675_s11 = sld [smem:[%s1941_s0 + %s1557_s4]]   ;;  %s1561_s4 = smov 22  }
  0x16   :  { %1953 = sst [smem:[#allocation12_spill]] %s1660_s20 }
  0x17   :  { %1954 = sst [smem:[#allocation13_spill]] %s1665_s27 }
  0x18   :  { %s1680_s30 = sld [smem:[%s1941_s0 + %s1558_s15]]   ;;  %s1562_s15 = smov 23  }
  0x19   :  { %s1685_s27 = sld [smem:[%s1941_s0 + %s1559_s22]]   ;;  %s1563_s22 = smov 24  }
  0x1a   :  { %s1690_s24 = sld [smem:[%s1941_s0 + %s1560_s3]]   ;;  %s1564_s3 = smov 25  }
  0x1b   :  { %s1695_s20 = sld [smem:[%s1941_s0 + %s1561_s4]]   ;;  %s1565_s4 = smov 26  }
  0x1e   :  { %1955 = sst [smem:[#allocation14_spill]] %s1680_s30 }
  0x1f   :  { %1956 = sst [smem:[#allocation15_spill]] %s1685_s27 }
  0x20   :  { %1957 = sst [smem:[#allocation16_spill]] %s1690_s24 }
  0x21   :  { %1958 = sst [smem:[#allocation17_spill]] %s1695_s20 }
  0x22   :  { %s1700_s30 = sld [smem:[%s1941_s0 + %s1562_s15]]   ;;  %s1566_s15 = smov 27  }
  0x23   :  { %s1705_s27 = sld [smem:[%s1941_s0 + %s1563_s22]]   ;;  %s1567_s22 = smov 29  }
  0x24   :  { %s1710_s24 = sld [smem:[%s1941_s0 + %s1564_s3]]   ;;  %s1568_s3 = smov 28  }
  0x25   :  { %s1715_s20 = sld [smem:[%s1941_s0 + %s1565_s4]]  }
  0x28   :  { %1959 = sst [smem:[#allocation18_spill]] %s1700_s30 }
  0x29   :  { %1960 = sst [smem:[#allocation19_spill]] %s1705_s27 }
  0x2a   :  { %1961 = sst [smem:[#allocation20_spill]] %s1710_s24 }
  0x2b   :  { %s1720_s30 = sld [smem:[%s1941_s0 + %s1566_s15]]  }
  0x2c   :  { %s1725_s27 = sld [smem:[%s1941_s0 + %s1567_s22]]  }
  0x2d   :  { %s1349_s24 = sld [smem:[%s1941_s0 + %s1568_s3]]  }
  0x33   :  { %v66_v1 = vstv %s1349_s24 }
  0x34   :  { %67 = vst [vmem:[#allocation3] sm:$0x1] %v66_v1 }
  0x35   :  { %68 = vsyncpa [#allocation5], 0 }
  0x36   :  { %69 = vsyncpa [#allocation6], 0  ;;  %s90_s4 = sshll.u32 %s1625_s8, 4  ;;  %s1569_s7 = smov [#allocation4]   ;;  %s91_s4 = int_to_ptr.hbm [resolvable:$true] %s90_s4 }
  0x37   :  { %s92_s10 = sshll.u32 %s1569_s7, 4  ;;  %s1488_s15 = sshra.s32 %s91_s4, 4  ;;  %s93_s10 = int_to_ptr.vmem [resolvable:$true] %s92_s10  ;;  %s1489_s15 = int_to_ptr.hbm [resolvable:$true] %s1488_s15 }
  0x38   :  { %s1490_s16 = scalar_lea.hbm %s1489_s15, 176  ;;  %s1492_s18 = scalar_lea.hbm %s1625_s8, 176 }
  0x39   :  { %p1491_p0 = scmp.ne.s32.totalorder %s1489_s15, %s1490_s16  ;;  %p1493_p1 = scmp.lt.s32.totalorder %s1489_s15, %s1625_s8 }
  0x3a   :  { %p1494_p2 = scmp.lt.s32.totalorder %s1492_s18, %s1490_s16 }
  0x3c   :  { %p1495_p3 = por %p1494_p2, %p1493_p1 }
  0x3e   :  { %p1496_p4 = pnand %p1495_p3, %p1491_p0 }
  0x40   :  { %1499 = shalt.err (!%p1496_p4)
}
  0x41   :  { %s1570_s0 = smov 128   ;;  %s1571_s24 = smov 8  }
  0x42   :  { %98 = dma.hbm_to_vmem [thread:$0]  %s91_s4, 2816, %s93_s10, [#allocation5], %s1570_s0, %s1570_s0, %s1571_s24  }
  0x43   :  { %1536 = dma.done.wait [#allocation5], 2816  }
  0x44   :  { %1537 = vsyncadd [#allocation5], 4294964480  ;;  %v145_v2 = vld [vmem:[%s1587_s5] sm:$0x3]  ;;  %s1572_s22 = smov 127   ;;  %s1573_s23 = smov 126  }
  0x45   :  { %v150_v3 = vperm.slane %v145_v2, 1  ;;  %v149_v4 = vperm.slane %v145_v2, 0  ;;  %vm158_vm0 = vcmask 351232   ;;  %vm155_vm1 = vcmask 1039360   ;;  %v268_v15 = vld [vmem:[#allocation4 + $0xa8] sm:$0xf] }
  0x46   :  { %vm167_vm2 = vcmask 343040   ;;  %vm164_vm3 = vcmask 1031168   ;;  %vm181_vm4 = vcmask 1040384   ;;  %vm184_vm5 = vcmask 1041408   ;;  %v146_v20 = vld [vmem:[%s1597_s13] sm:$0xff]  ;;  %v261_v25 = vld [vmem:[#allocation4 + $0x70] sm:$0xff] }
  0x47   :  { %153 = vrot.lane.b32.xlu0 %v150_v3, %s1572_s22  ;;  %151 = vrot.lane.b32.xlu1 %v149_v4, %s1572_s22  ;;  %vm288_vm6 = vcmask 1043456   ;;  %vm194_vm7 = vcmask 1042432   ;;  %vm187_vm8 = vcmask 23552   ;;  %v267_v21 = vld [vmem:[#allocation4 + $0xa0] sm:$0xff]  ;;  %v262_v24 = vld [vmem:[#allocation4 + $0x78] sm:$0xff]  ;;  %v260_v26 = vld [vmem:[#allocation4 + $0x68] sm:$0xff] }
  0x48   :  { %1357 = vmatpush.msk.msra.mxu3 %vm288_vm6, %v268_v15  ;;  %v259_v27 = vld [vmem:[#allocation4 + $0x60] sm:$0xff]  ;;  %v258_v29 = vld [vmem:[#allocation4 + $0x58] sm:$0xff]  ;;  %v257_v30 = vld [vmem:[#allocation4 + $0x50] sm:$0xff]  ;;  %v1574_v46 = vmov 0   ;;  %vm281_vm9 = vcmask 359424   ;;  %vm366_vm10 = vcmask 703488  }
  0x49   :  { %v147_v28 = vld [vmem:[%s1597_s13 + $0x8] sm:$0xff]  ;;  %v254_v33 = vld [vmem:[#allocation4 + $0x38] sm:$0xff]  ;;  %v253_v34 = vld [vmem:[#allocation4 + $0x30] sm:$0xff]  ;;  %1448 = vset.pattern.permute.xlu2 %v1574_v46  ;;  %1449 = vset.pattern.permute.xlu1 %v1574_v46  ;;  %vm357_vm11 = vcmask 711680   ;;  %vm369_vm12 = vcmask 392192   ;;  %s1575_s5 = smov 1  }
  0x4a   :  { %326 = vmatpush.msra.mxu3 %v267_v21  ;;  %v256_v31 = vld [vmem:[#allocation4 + $0x48] sm:$0xff]  ;;  %v255_v32 = vld [vmem:[#allocation4 + $0x40] sm:$0xff]  ;;  %v250_v37 = vld [vmem:[#allocation4 + $0x18] sm:$0xff]  ;;  %1450 = vset.pattern.permute.xlu0 %v1574_v46  ;;  %vm407_vm13 = vcmask 7168   ;;  %vm490_vm14 = vcmask 719872   ;;  %vm519_vm15 = vcmask 15360  }
  0x4b   :  { %v252_v35 = vld [vmem:[#allocation4 + $0x28] sm:$0xff]  ;;  %v251_v36 = vld [vmem:[#allocation4 + $0x20] sm:$0xff]  ;;  %v249_v38 = vld [vmem:[#allocation4 + $0x10] sm:$0xff]  ;;  %s1963_s13 = sld [smem:[#allocation12_spill]]  ;;  %s1312_s26 = sshll.u32 %s1725_s27, 4  ;;  %s1313_s26 = int_to_ptr.hbm [resolvable:$true] %s1312_s26 }
  0x4c   :  { %v248_v39 = vld [vmem:[#allocation4 + $0x8] sm:$0xff]  ;;  %v247_v40 = vld [vmem:[#allocation4] sm:$0xff]  ;;  %v266_v41 = vld [vmem:[#allocation4 + $0x98] sm:$0xff]  ;;  %s1968_s8 = sld [smem:[#allocation18_spill]]  ;;  %s1524_s3 = sshra.s32 %s1313_s26, 4  ;;  %s1525_s3 = int_to_ptr.hbm [resolvable:$true] %s1524_s3 }
  0x4d   :  { %327 = vmatpush.msra.mxu3 %v266_v41  ;;  %v265_v42 = vld [vmem:[#allocation4 + $0x90] sm:$0xff]  ;;  %v264_v43 = vld [vmem:[#allocation4 + $0x88] sm:$0xff]  ;;  %v263_v44 = vld [vmem:[#allocation4 + $0x80] sm:$0xff]  ;;  %s1528_s28 = scalar_lea.hbm %s1725_s27, 1  ;;  %p1529_p6 = scmp.lt.s32.totalorder %s1525_s3, %s1725_s27 }
  0x4e   :  { %v270_v45 = vld [vmem:[%s1602_s17 + $0x8] sm:$0xff]  ;;  %v269_v47 = vld [vmem:[%s1602_s17] sm:$0xff]  ;;  %s1964_s17 = sld [smem:[#allocation17_spill]] }
  0x4f   :  { %162 = vrot.lane.b32.xlu0 %v150_v3, %s1573_s23  ;;  %160 = vrot.lane.b32.xlu1 %v149_v4, %s1573_s23  ;;  %v1469_v59 = vld [vmem:[%s1650_s6] ss:$0 sm:$0xff]  ;;  %s1971_s6 = sld [smem:[#allocation19_spill]] }
  0x50   :  { %328 = vmatpush.msra.mxu3 %v265_v42  ;;  %278 = vperm.xlu2 %1448, %v270_v45   ;;  %v518_v45 = vld [vmem:[%s1670_s2] sm:$0x3]  ;;  %s1972_s2 = sld [smem:[#allocation20_spill]] }
  0x52   :  { %329 = vmatpush.msra.mxu3 %v264_v43  ;;  %v430_v43 = vld [vmem:[%s1617_s29] sm:$0x1]  ;;  %s1967_s29 = sld [smem:[#allocation13_spill]] }
  0x54   :  { %330 = vmatpush.msra.mxu3 %v263_v44  ;;  %v472_v44 = vld [vmem:[%s1630_s14] sm:$0xff] }
  0x58   :  { %273 = vperm.xlu2 %1448, %v269_v47   ;;  %v483_v47 = vld [vmem:[#allocation2] sm:$0x1] }
  0xaa   :  { %v279_v52 = vpop.permute.xlu2 %278 }
  0xb2   :  { %v274_v54 = vpop.permute.xlu2 %273 }
  0xb9   :  { %v154_v5 = vpop.permute.xlu0 %153  ;;  %v152_v6 = vpop.permute.xlu1 %151 }
  0xba   :  { %v159_v7 = vsel %vm158_vm0, %v154_v5, 0.0  ;;  %v156_v8 = vsel %vm155_vm1, %v152_v6, %v154_v5  ;;  %v411_v5 = vld [vmem:[%s1612_s25 + $0x8] sm:$0xff]  ;;  %vm637_vm0 = vcmask 1045504   ;;  %vm581_vm1 = vcmask 367616  }
  0xbb   :  { %v173_v9 = vrot.slane %v159_v7, 7  ;;  %v172_v10 = vrot.slane %v156_v8, 7 }
  0xbd   :  { %v182_v18 = vsel %vm181_vm4, %v149_v4, %v172_v10  ;;  %v183_v19 = vsel %vm181_vm4, %v150_v3, %v173_v9  ;;  %v347_v10 = vld [vmem:[%s1607_s21] sm:$0xff] }
  0xc1   :  { %v163_v11 = vpop.permute.xlu0 %162  ;;  %v161_v12 = vpop.permute.xlu1 %160 }
  0xc2   :  { %v168_v13 = vsel %vm167_vm2, %v163_v11, 0.0  ;;  %v165_v14 = vsel %vm164_vm3, %v161_v12, %v163_v11  ;;  %v348_v11 = vld [vmem:[%s1607_s21 + $0x8] sm:$0xff]  ;;  %vm591_vm2 = vcmask 97280   ;;  %vm630_vm3 = vcmask 375808   ;;  %s1965_s21 = sld [smem:[#allocation10_spill]] }
  0xc3   :  { %v178_v16 = vrot.slane %v168_v13, 6  ;;  %v177_v17 = vrot.slane %v165_v14, 6  ;;  %v410_v14 = vld [vmem:[%s1612_s25] sm:$0xff]  ;;  %s1966_s25 = sld [smem:[#allocation15_spill]] }
  0xc5   :  { %v185_v22 = vsel %vm184_vm5, %v182_v18, %v177_v17  ;;  %v186_v23 = vsel %vm184_vm5, %v183_v19, %v178_v16 }
  0xc6   :  { %1351 = vmatpush.msk.msra.mxu0 %vm194_vm7, %v185_v22  ;;  %1354 = vmatpush.msk.msra.mxu2 %vm194_vm7, %v186_v23 }
  0xc7   :  { %1352 = vmatmul.msk.f32.vlgmr.msra.gmra.mxu0 %vm187_vm8, %v146_v20  ;;  %1355 = vmatmul.msk.f32.vlgmr.msra.gmra.mxu2 %vm187_vm8, %v146_v20 }
  0xc8   :  { %292 = vmatpush.msrb.mxu2 %v262_v24 }
  0xca   :  { %293 = vmatpush.msrb.mxu2 %v261_v25 }
  0xcc   :  { %294 = vmatpush.msrb.mxu2 %v260_v26 }
  0xce   :  { %295 = vmatpush.msrb.mxu2 %v259_v27 }
  0xcf   :  { %1353 = vmatmul.msk.f32.gmra.mxu0 %vm187_vm8, %v147_v28  ;;  %1356 = vmatmul.msk.f32.gmra.mxu2 %vm187_vm8, %v147_v28 }
  0xd0   :  { %296 = vmatpush.msrb.mxu2 %v258_v29 }
  0xd2   :  { %297 = vmatpush.msrb.mxu2 %v257_v30  ;;  %v482_v30 = vld [vmem:[%s1630_s14 + $0x50] sm:$0xff] }
  0xd3   :  { %499 = vmatpush.msrb.mxu3 %v482_v30 }
  0xd4   :  { %298 = vmatpush.msrb.mxu2 %v256_v31  ;;  %v481_v31 = vld [vmem:[%s1630_s14 + $0x48] sm:$0xff] }
  0xd5   :  { %500 = vmatpush.msrb.mxu3 %v481_v31 }
  0xd6   :  { %299 = vmatpush.msrb.mxu2 %v255_v32  ;;  %v480_v32 = vld [vmem:[%s1630_s14 + $0x40] sm:$0xff] }
  0xd7   :  { %501 = vmatpush.msrb.mxu3 %v480_v32 }
  0xd8   :  { %300 = vmatpush.msrb.mxu2 %v254_v33  ;;  %v479_v33 = vld [vmem:[%s1630_s14 + $0x38] sm:$0xff] }
  0xd9   :  { %502 = vmatpush.msrb.mxu3 %v479_v33 }
  0xda   :  { %301 = vmatpush.msrb.mxu2 %v253_v34  ;;  %v478_v34 = vld [vmem:[%s1630_s14 + $0x30] sm:$0xff] }
  0xdb   :  { %503 = vmatpush.msrb.mxu3 %v478_v34 }
  0xdc   :  { %302 = vmatpush.msrb.mxu2 %v252_v35  ;;  %v477_v35 = vld [vmem:[%s1630_s14 + $0x28] sm:$0xff] }
  0xdd   :  { %504 = vmatpush.msrb.mxu3 %v477_v35 }
  0xde   :  { %303 = vmatpush.msrb.mxu2 %v251_v36  ;;  %v476_v36 = vld [vmem:[%s1630_s14 + $0x20] sm:$0xff] }
  0xdf   :  { %505 = vmatpush.msrb.mxu3 %v476_v36 }
  0xe0   :  { %304 = vmatpush.msrb.mxu2 %v250_v37  ;;  %v475_v37 = vld [vmem:[%s1630_s14 + $0x18] sm:$0xff] }
  0xe1   :  { %506 = vmatpush.msrb.mxu3 %v475_v37  ;;  %v1818_v37 = vld [vmem:[%s1963_s13] ss:$0 sm:$0xff] }
  0xe2   :  { %305 = vmatpush.msrb.mxu2 %v249_v38  ;;  %v474_v38 = vld [vmem:[%s1630_s14 + $0x10] sm:$0xff] }
  0xe3   :  { %507 = vmatpush.msrb.mxu3 %v474_v38 }
  0xe4   :  { %306 = vmatpush.msrb.mxu2 %v248_v39  ;;  %v473_v39 = vld [vmem:[%s1630_s14 + $0x8] sm:$0xff]  ;;  %s1969_s14 = sld [smem:[#allocation11_spill]] }
  0xe5   :  { %508 = vmatpush.msrb.mxu3 %v473_v39 }
  0xe6   :  { %307 = vmatpush.msrb.mxu2 %v247_v40 }
  0xe7   :  { %509 = vmatpush.msrb.mxu3 %v472_v44 }
 0x144   :  { %v218_v48 = vpop.f32.mrf.mxu0 }
 0x145   :  { %308 = vmatmul.f32.vlgmr.msrb.gmra.mxu2 %v218_v48 }
 0x14a   :  { %v241_v49 = vpop.f32.mrf.mxu2 }
 0x14b   :  { %1358 = vmatmul.msk.f32.vlgmr.msra.gmra.mxu3 %vm281_vm9, %v241_v49  ;;  %v517_v49 = vld [vmem:[%s1592_s9] sm:$0xf]  ;;  %s1962_s9 = sld [smem:[#allocation14_spill]] }
 0x14c   :  { %v221_v50 = vpop.f32.mrf.mxu0  ;;  %1372 = vmatpush.msk.msra.mxu3 %vm184_vm5, %v518_v45 }
 0x14d   :  { %311 = vmatmul.f32.gmra.mxu2 %v221_v50 }
 0x152   :  { %v244_v51 = vpop.f32.mrf.mxu2 }
 0x153   :  { %1359 = vmatmul.msk.f32.gmra.mxu3 %vm281_vm9, %v244_v51 }
 0x1c8   :  { %v309_v53 = vpop.f32.mrf.mxu2 }
 0x1c9   :  { %v310_v55 = vadd.f32 %v309_v53, %v274_v54  ;;  %v546_v53 = vld [vmem:[%s1675_s11] sm:$0x7f] }
 0x1ca   :  { %v549_v54 = vrot.slane %v546_v53, 4 }
 0x1ce   :  { %v332_v56 = vpop.f32.mrf.mxu3 }
 0x1cf   :  { %v333_v57 = vadd.f32 %v332_v56, %v310_v55 }
 0x1d0   :  { %v312_v60 = vpop.f32.mrf.mxu2 }
 0x1d1   :  { %v338_v58 = vmul.f32 0.2, %v333_v57  ;;  %v313_v62 = vadd.f32 %v312_v60, %v279_v52 }
 0x1d3   :  { %v340_v61 = vmax.f32 %v333_v57, %v338_v58  ;;  %v561_v58 = vrot.slane %v546_v53, 3 }
 0x1d5   :  { %v345_v63 = vmul.f32 %v1469_v59, %v340_v61 }
 0x1d6   :  { %v335_v0 = vpop.f32.mrf.mxu3 }
 0x1d7   :  { %v336_v1 = vadd.f32 %v335_v0, %v313_v62  ;;  %360 = vrot.lane.b32.xlu1 %v345_v63, %s1573_s23 }
 0x1d9   :  { %v339_v2 = vmul.f32 0.2, %v336_v1 }
 0x1db   :  { %v341_v3 = vmax.f32 %v336_v1, %v339_v2 }
 0x1dd   :  { %v346_v4 = vmul.f32 %v1469_v59, %v341_v3 }
 0x1df   :  { %353 = vrot.lane.b32.xlu2 %v346_v4, %s1572_s22  ;;  %362 = vrot.lane.b32.xlu0 %v346_v4, %s1573_s23 }
 0x1e7   :  { %419 = vperm.xlu2 %1448, %v411_v5   ;;  %351 = vrot.lane.b32.xlu0 %v345_v63, %s1572_s22 }
 0x239   :  { %v354_v8 = vpop.permute.xlu2 %353 }
 0x241   :  { %v420_v16 = vpop.permute.xlu2 %419 }
 0x249   :  { %v361_v7 = vpop.permute.xlu1 %360 }
 0x251   :  { %v363_v6 = vpop.permute.xlu0 %362 }
 0x252   :  { %1360 = vmatpush.msk.msrb.mxu0 %vm366_vm10, %v363_v6 }
 0x254   :  { %1361 = vmatpush.msk.msrb.mxu0 %vm366_vm10, %v361_v7 }
 0x256   :  { %1362 = vmatpush.msk.msrb.mxu0 %vm357_vm11, %v354_v8 }
 0x259   :  { %v352_v9 = vpop.permute.xlu0 %351 }
 0x25a   :  { %1363 = vmatpush.msk.msrb.mxu0 %vm357_vm11, %v352_v9 }
 0x25c   :  { %390 = vmatpush.msrb.mxu0 %v346_v4  ;;  %v144_v4 = vld [vmem:[%s1655_s12] sm:$0x1]  ;;  %s1577_s12 = smov 124  }
 0x25e   :  { %391 = vmatpush.msrb.mxu0 %v345_v63 }
 0x25f   :  { %1364 = vmatmul.msk.f32.vlgmr.msrb.gmra.mxu0 %vm369_vm12, %v347_v10 }
 0x267   :  { %1365 = vmatmul.msk.f32.gmra.mxu0 %vm369_vm12, %v348_v11 }
 0x2dc   :  { %v393_v12 = vpop.f32.mrf.mxu0 }
 0x2dd   :  { %401 = vrot.lane.b32.xlu0 %v393_v12, %s1575_s5 }
 0x2e4   :  { %v396_v13 = vpop.f32.mrf.mxu0 }
 0x2e5   :  { %403 = vrot.lane.b32.xlu1 %v396_v13, %s1575_s5 }
 0x2ed   :  { %414 = vperm.xlu1 %1449, %v410_v14  }
 0x34f   :  { %v402_v20 = vpop.permute.xlu0 %401 }
 0x350   :  { %v408_v22 = vsel %vm407_vm13, 0.0, %v402_v20  ;;  %v626_v20 = vld [vmem:[%s1635_s19 + $0x10] sm:$0xff] }
 0x357   :  { %v404_v15 = vpop.permute.xlu1 %403 }
 0x358   :  { %v409_v17 = vsel %vm407_vm13, 0.0, %v404_v15  ;;  %vm768_vm13 = vcmask 195584  }
 0x359   :  { %v423_v18 = vadd.f32 %v420_v16, %v409_v17  ;;  %v629_v17 = vld [vmem:[%s1635_s19 + $0x28] sm:$0x3f] }
 0x35b   :  { %v425_v19 = vmul.f32 0.2, %v423_v18 }
 0x35d   :  { %v427_v21 = vmax.f32 %v423_v18, %v425_v19  ;;  %v628_v18 = vld [vmem:[%s1635_s19 + $0x20] sm:$0xff]  ;;  %v627_v19 = vld [vmem:[%s1635_s19 + $0x18] sm:$0xff] }
 0x35f   :  { %v415_v23 = vpop.permute.xlu1 %414  ;;  %v429_v24 = vmul.f32 %v1469_v59, %v427_v21  ;;  %v625_v21 = vld [vmem:[%s1635_s19 + $0x8] sm:$0xff] }
 0x360   :  { %v422_v25 = vadd.f32 %v415_v23, %v408_v22 }
 0x361   :  { %435 = vrot.lane.b32.xlu1 %v429_v24, %s1572_s22  ;;  %443 = vrot.lane.b32.xlu2 %v429_v24, %s1573_s23 }
 0x362   :  { %v424_v26 = vmul.f32 0.2, %v422_v25 }
 0x364   :  { %v426_v27 = vmax.f32 %v422_v25, %v424_v26  ;;  %v575_v25 = vld [vmem:[%s1962_s9] sm:$0xff] }
 0x366   :  { %v428_v28 = vmul.f32 %v1469_v59, %v426_v27  ;;  %v576_v27 = vld [vmem:[%s1962_s9 + $0x8] sm:$0xff] }
 0x368   :  { %441 = vrot.lane.b32.xlu0 %v428_v28, %s1573_s23 }
 0x369   :  { %433 = vrot.lane.b32.xlu2 %v428_v28, %s1572_s22 }
 0x370   :  { %486 = vperm.xlu0 %1450, %v483_v47  }
 0x3bb   :  { %v444_v29 = vpop.permute.xlu2 %443 }
 0x3bc   :  { %1366 = vmatpush.msk.msra.mxu1 %vm366_vm10, %v444_v29 }
 0x3c3   :  { %v434_v42 = vpop.permute.xlu2 %433 }
 0x3d3   :  { %v436_v41 = vpop.permute.xlu1 %435 }
 0x3da   :  { %v442_v40 = vpop.permute.xlu0 %441 }
 0x3db   :  { %1367 = vmatpush.msk.msra.mxu1 %vm366_vm10, %v442_v40 }
 0x3dd   :  { %1368 = vmatpush.msk.msra.mxu1 %vm357_vm11, %v436_v41 }
 0x3df   :  { %1369 = vmatpush.msk.msra.mxu1 %vm357_vm11, %v434_v42 }
 0x3e1   :  { %466 = vmatpush.msra.mxu1 %v429_v24 }
 0x3e2   :  { %v487_v51 = vpop.permute.xlu0 %486 }
 0x3e3   :  { %467 = vmatpush.msra.mxu1 %v428_v28  ;;  %v489_v52 = vperm.slane %v487_v51, 0  ;;  %v624_v28 = vld [vmem:[%s1635_s19] sm:$0xff]  ;;  %v714_v51 = vld [vmem:[%s1964_s17 + $0x8] sm:$0xff]  ;;  %s1970_s19 = sld [smem:[#allocation16_spill]] }
 0x3e4   :  { %1370 = vmatmul.msk.f32.vlgmr.msra.gmra.mxu1 %vm369_vm12, %v430_v43 }
 0x3e5   :  { %1377 = vmatpush.msk.msrb.mxu1 %vm637_vm0, %v629_v17 }
 0x3e7   :  { %652 = vmatpush.msrb.mxu1 %v628_v18 }
 0x3e9   :  { %653 = vmatpush.msrb.mxu1 %v627_v19 }
 0x3eb   :  { %654 = vmatpush.msrb.mxu1 %v626_v20 }
 0x3ed   :  { %655 = vmatpush.msrb.mxu1 %v625_v21 }
 0x3ef   :  { %656 = vmatpush.msrb.mxu1 %v624_v28  ;;  %v814_v28 = vld [vmem:[%s1965_s21 + $0x10] sm:$0xff] }
 0x461   :  { %v469_v48 = vpop.f32.mrf.mxu1 }
 0x462   :  { %1371 = vmatmul.msk.f32.vlgmr.msrb.gmra.mxu3 %vm490_vm14, %v469_v48  ;;  %vm759_vm14 = vcmask 203776  }
 0x46a   :  { %1373 = vmatmul.msk.f32.vlgmr.msra.gmra.mxu3 %vm519_vm15, %v517_v49 }
 0x4e5   :  { %v511_v50 = vpop.f32.mrf.mxu3 }
 0x4e6   :  { %v512_v55 = vadd.f32 %v511_v50, %v489_v52  ;;  %v1576_v52 = vmov 1  }
 0x4e7   :  { %1451 = vset.pattern.permute.xlu0 %v1576_v52 }
 0x4e8   :  { %v514_v61 = vmul.f32 0.2, %v512_v55 }
 0x4ea   :  { %v515_v3 = vmax.f32 %v512_v55, %v514_v61 }
 0x4ec   :  { %v516_v9 = vmul.f32 %v515_v3, %v144_v4 }
 0x4ed   :  { %v543_v56 = vpop.f32.mrf.mxu3 }
 0x4ee   :  { %v547_v57 = vmul.f32 %v546_v53, %v543_v56 }
 0x4f0   :  { %v551_v59 = vadd.f32 %v549_v54, %v547_v57  ;;  %v555_v60 = vrot.slane %v547_v57, 1  ;;  %v563_v0 = vadd.f32 %v561_v58, %v547_v57 }
 0x4f2   :  { %v552_v62 = vmul.f32 0.2, %v551_v59  ;;  %v557_v63 = vadd.f32 %v555_v60, %v547_v57  ;;  %v564_v7 = vmul.f32 0.2, %v563_v0 }
 0x4f4   :  { %v553_v1 = vmax.f32 %v551_v59, %v552_v62  ;;  %v558_v2 = vadd.f32 %v557_v63, %v549_v54  ;;  %v565_v11 = vmax.f32 %v563_v0, %v564_v7 }
 0x4f6   :  { %v559_v5 = vmul.f32 0.2, %v558_v2  ;;  %v567_v6 = vrot.slane %v553_v1, 7  ;;  %v713_v1 = vld [vmem:[%s1964_s17] sm:$0xff] }
 0x4f8   :  { %v560_v8 = vmax.f32 %v558_v2, %v559_v5  ;;  %v572_v12 = vsel %vm181_vm4, %v516_v9, %v567_v6  ;;  %vm665_vm4 = vcmask 211968  }
 0x4fa   :  { %v570_v10 = vrot.slane %v560_v8, 7 }
 0x4fc   :  { %v573_v13 = vsel %vm184_vm5, %v572_v12, %v570_v10 }
 0x4fd   :  { %v574_v14 = vsel %vm194_vm7, %v573_v13, %v565_v11 }
 0x4fe   :  { %583 = vrot.lane.b32.xlu2 %v574_v14, %s1573_s23  ;;  %578 = vrot.lane.b32.xlu1 %v574_v14, %s1572_s22 }
 0x558   :  { %v584_v15 = vpop.permute.xlu2 %583 }
 0x559   :  { %v586_v16 = vsel %vm281_vm9, %v584_v15, 0.0 }
 0x55a   :  { %1374 = vmatpush.msk.msra.mxu0 %vm288_vm6, %v586_v16 }
 0x570   :  { %v579_v22 = vpop.permute.xlu1 %578 }
 0x571   :  { %v582_v23 = vsel %vm581_vm1, %v579_v22, 0.0 }
 0x572   :  { %v588_v24 = vrot.slane %v582_v23, 4 }
 0x574   :  { %v590_v26 = vsel %vm288_vm6, %v574_v14, %v588_v24 }
 0x575   :  { %616 = vmatpush.msra.mxu0 %v590_v26 }
 0x576   :  { %1375 = vmatmul.msk.f32.vlgmr.msra.gmra.mxu0 %vm591_vm2, %v575_v25 }
 0x57e   :  { %1376 = vmatmul.msk.f32.gmra.mxu0 %vm591_vm2, %v576_v27  ;;  %v815_v27 = vld [vmem:[%s1965_s21 + $0x18] sm:$0x3] }
 0x57f   :  { %1388 = vmatpush.msk.msra.mxu2 %vm184_vm5, %v815_v27  ;;  %vm861_vm5 = vcmask 130048  }
 0x581   :  { %844 = vmatpush.msra.mxu2 %v814_v28 }
 0x5f3   :  { %v618_v29 = vpop.f32.mrf.mxu0 }
 0x5f4   :  { %1378 = vmatmul.msk.f32.vlgmr.msrb.gmra.mxu1 %vm630_vm3, %v618_v29 }
 0x5fb   :  { %v621_v30 = vpop.f32.mrf.mxu0 }
 0x5fc   :  { %1379 = vmatmul.msk.f32.gmra.mxu1 %vm630_vm3, %v621_v30  ;;  %v813_v30 = vld [vmem:[%s1965_s21 + $0x8] sm:$0xff] }
 0x5fd   :  { %845 = vmatpush.msra.mxu2 %v813_v30 }
 0x671   :  { %v658_v31 = vpop.f32.mrf.mxu1 }
 0x672   :  { %v666_v32 = vsel %vm665_vm4, %v658_v31, 0.0 }
 0x673   :  { %667 = vadd.xlane.f32.xlu2 %v666_v32  ;;  %v748_v32 = vld [vmem:[%s1966_s25 + $0x8] sm:$0xff] }
 0x679   :  { %v661_v33 = vpop.f32.mrf.mxu1 }
 0x67a   :  { %v669_v34 = vsel %vm665_vm4, %v661_v33, 0.0 }
 0x67b   :  { %670 = vadd.xlane.f32.xlu1 %v669_v34  ;;  %v750_v34 = vld [vmem:[%s1966_s25 + $0x18] sm:$0xff] }
 0x6e6   :  { %v668_v35 = vpop.xlane.xlu2 %667 }
 0x6e7   :  { %v672_v36 = vmul.f32 0.045454547, %v668_v35  ;;  %v812_v35 = vld [vmem:[%s1965_s21] sm:$0xff] }
 0x6e8   :  { %846 = vmatpush.msra.mxu2 %v812_v35 }
 0x6e9   :  { %v674_v38 = vsub.f32 %v658_v31, %v672_v36  ;;  %v747_v31 = vld [vmem:[%s1966_s25] sm:$0xff] }
 0x6eb   :  { %v679_v39 = vmul.f32 %v1818_v37, %v674_v38 }
 0x6ed   :  { %v681_v40 = vmul.f32 %v679_v39, %v679_v39 }
 0x6ee   :  { %v671_v41 = vpop.xlane.xlu1 %670 }
 0x6ef   :  { %v673_v42 = vmul.f32 0.045454547, %v671_v41  ;;  %v683_v43 = vsel %vm665_vm4, %v681_v40, 0.0 }
 0x6f0   :  { %684 = vadd.xlane.f32.xlu2 %v683_v43 }
 0x6f1   :  { %v675_v44 = vsub.f32 %v661_v33, %v673_v42  ;;  %v749_v33 = vld [vmem:[%s1966_s25 + $0x10] sm:$0xff] }
 0x6f3   :  { %v680_v45 = vmul.f32 %v1818_v37, %v675_v44 }
 0x6f5   :  { %v682_v47 = vmul.f32 %v680_v45, %v680_v45 }
 0x6f7   :  { %v686_v48 = vsel %vm665_vm4, %v682_v47, 0.0 }
 0x6f8   :  { %687 = vadd.xlane.f32.xlu0 %v686_v48 }
 0x70c   :  { %736 = vperm.xlu0 %1451, %v714_v51  }
 0x763   :  { %v685_v49 = vpop.xlane.xlu2 %684 }
 0x764   :  { %v689_v50 = vmul.f32 0.045454547, %v685_v49 }
 0x766   :  { %v691_v53 = vadd.f32 1e-05, %v689_v50 }
 0x768   :  { %1472 = vrsqrt.f32 %v691_v53  ;;  %vm699_vm7 = vweird.f32 %v691_v53 }
 0x76b   :  { %v688_v54 = vpop.xlane.xlu0 %687 }
 0x76c   :  { %v690_v55 = vmul.f32 0.045454547, %v688_v54 }
 0x76e   :  { %v1473_v56 = vpop.eup %1472  ;;  %v692_v57 = vadd.f32 1e-05, %v690_v55 }
 0x76f   :  { %v694_v58 = vmul.f32 %v1473_v56, %v691_v53  ;;  %vm700_vm6 = vweird.f32 %v1473_v56 }
 0x770   :  { %1474 = vrsqrt.f32 %v692_v57  ;;  %vm701_vm8 = vmor %vm699_vm7, %vm700_vm6  ;;  %vm709_vm10 = vweird.f32 %v692_v57 }
 0x771   :  { %v695_v59 = vmul.f32 %v1473_v56, %v694_v58 }
 0x773   :  { %v696_v60 = vmul.f32 0.5, %v695_v59 }
 0x775   :  { %v697_v61 = vsub.f32 1.5, %v696_v60 }
 0x776   :  { %v1475_v62 = vpop.eup %1474 }
 0x777   :  { %v704_v63 = vmul.f32 %v1475_v62, %v692_v57  ;;  %v698_v0 = vmul.f32 %v1473_v56, %v697_v61  ;;  %vm710_vm9 = vweird.f32 %v1475_v62 }
 0x778   :  { %vm711_vm11 = vmor %vm709_vm10, %vm710_vm9 }
 0x779   :  { %v705_v2 = vmul.f32 %v1475_v62, %v704_v63  ;;  %v702_v3 = vsel %vm701_vm8, %v1473_v56, %v698_v0 }
 0x77a   :  { %v715_v4 = vmul.f32 %v713_v1, %v702_v3 }
 0x77b   :  { %v706_v5 = vmul.f32 0.5, %v705_v2 }
 0x77c   :  { %719 = vperm.xlu2 %1448, %v715_v4  }
 0x77d   :  { %v707_v6 = vsub.f32 1.5, %v706_v5 }
 0x77e   :  { %v737_v11 = vpop.permute.xlu0 %736 }
 0x77f   :  { %v708_v7 = vmul.f32 %v1475_v62, %v707_v6 }
 0x781   :  { %v712_v8 = vsel %vm711_vm11, %v1475_v62, %v708_v7 }
 0x782   :  { %v716_v9 = vmul.f32 %v714_v51, %v712_v8  ;;  %v1859_v51 = vld [vmem:[%s1967_s29] ss:$0 sm:$0xff] }
 0x784   :  { %724 = vperm.xlu1 %1449, %v716_v9  }
 0x78c   :  { %1452 = vset.pattern.permute.xlu1 %v1576_v52 }
 0x78d   :  { %731 = vperm.xlu1 %1452, %v713_v1  }
 0x795   :  { %1453 = vset.pattern.permute.xlu1 %v1574_v46 }
 0x7d6   :  { %v720_v14 = vpop.permute.xlu2 %719 }
 0x7d7   :  { %v727_v17 = vmul.f32 %v720_v14, %v679_v39 }
 0x7f6   :  { %v725_v10 = vpop.permute.xlu1 %724 }
 0x7f7   :  { %v728_v12 = vmul.f32 %v725_v10, %v680_v45 }
 0x7f9   :  { %v740_v13 = vadd.f32 %v737_v11, %v728_v12  ;;  %v956_v11 = vld [vmem:[%s1968_s8 + $0x18] sm:$0xff]  ;;  %v955_v12 = vld [vmem:[%s1968_s8 + $0x10] sm:$0xff] }
 0x7fb   :  { %v742_v15 = vmul.f32 0.2, %v740_v13 }
 0x7fd   :  { %v744_v16 = vmax.f32 %v740_v13, %v742_v15  ;;  %v1888_v13 = vld [vmem:[%s1968_s8] sm:$0xff] }
 0x7ff   :  { %v732_v18 = vpop.permute.xlu1 %731  ;;  %v746_v19 = vmul.f32 %v1818_v37, %v744_v16 }
 0x800   :  { %v739_v20 = vadd.f32 %v732_v18, %v727_v17 }
 0x801   :  { %764 = vrot.lane.b32.xlu2 %v746_v19, %s1573_s23 }
 0x802   :  { %v741_v21 = vmul.f32 0.2, %v739_v20 }
 0x804   :  { %v743_v22 = vmax.f32 %v739_v20, %v741_v21 }
 0x806   :  { %v745_v23 = vmul.f32 %v1818_v37, %v743_v22 }
 0x808   :  { %762 = vrot.lane.b32.xlu1 %v745_v23, %s1573_s23 }
 0x809   :  { %755 = vrot.lane.b32.xlu2 %v746_v19, %s1572_s22 }
 0x810   :  { %753 = vrot.lane.b32.xlu1 %v745_v23, %s1572_s22 }
 0x85b   :  { %v765_v24 = vpop.permute.xlu2 %764 }
 0x85c   :  { %1380 = vmatpush.msk.msrb.mxu3 %vm768_vm13, %v765_v24 }
 0x863   :  { %v756_v26 = vpop.permute.xlu2 %755 }
 0x87a   :  { %v763_v25 = vpop.permute.xlu1 %762 }
 0x87b   :  { %1381 = vmatpush.msk.msrb.mxu3 %vm768_vm13, %v763_v25 }
 0x87d   :  { %1382 = vmatpush.msk.msrb.mxu3 %vm759_vm14, %v756_v26 }
 0x882   :  { %v754_v29 = vpop.permute.xlu1 %753 }
 0x883   :  { %1383 = vmatpush.msk.msrb.mxu3 %vm759_vm14, %v754_v29  ;;  %vm1056_vm14 = vcmask 113664  }
 0x885   :  { %797 = vmatpush.msrb.mxu3 %v746_v19 }
 0x887   :  { %798 = vmatpush.msrb.mxu3 %v745_v23 }
 0x888   :  { %1384 = vmatmul.msk.f32.vlgmr.msrb.gmra.mxu3 %vm369_vm12, %v747_v31  ;;  %v954_v31 = vld [vmem:[%s1968_s8 + $0x8] sm:$0xff] }
 0x890   :  { %1385 = vmatmul.msk.f32.gmra.mxu3 %vm369_vm12, %v748_v32 }
 0x898   :  { %1386 = vmatmul.msk.f32.gmra.mxu3 %vm369_vm12, %v749_v33 }
 0x8a0   :  { %1387 = vmatmul.msk.f32.gmra.mxu3 %vm369_vm12, %v750_v34 }
 0x90b   :  { %v800_v36 = vpop.f32.mrf.mxu3 }
 0x90c   :  { %1389 = vmatmul.msk.f32.vlgmr.msra.gmra.mxu2 %vm665_vm4, %v800_v36 }
 0x913   :  { %v803_v37 = vpop.f32.mrf.mxu3 }
 0x914   :  { %1390 = vmatmul.msk.f32.gmra.mxu2 %vm665_vm4, %v803_v37 }
 0x91b   :  { %v806_v38 = vpop.f32.mrf.mxu3 }
 0x91c   :  { %1391 = vmatmul.msk.f32.gmra.mxu2 %vm665_vm4, %v806_v38 }
 0x923   :  { %v809_v39 = vpop.f32.mrf.mxu3 }
 0x924   :  { %1392 = vmatmul.msk.f32.gmra.mxu2 %vm665_vm4, %v809_v39 }
 0x98f   :  { %v848_v40 = vpop.f32.mrf.mxu2 }
 0x990   :  { %v862_v48 = vsel %vm861_vm5, %v848_v40, 0.0 }
 0x997   :  { %v851_v41 = vpop.f32.mrf.mxu2 }
 0x998   :  { %v865_v42 = vsel %vm861_vm5, %v851_v41, 0.0 }
 0x999   :  { %866 = vadd.xlane.f32.xlu1 %v865_v42 }
 0x99f   :  { %v854_v43 = vpop.f32.mrf.mxu2 }
 0x9a0   :  { %v868_v44 = vsel %vm861_vm5, %v854_v43, 0.0 }
 0x9a1   :  { %869 = vadd.xlane.f32.xlu0 %v868_v44 }
 0x9a7   :  { %v857_v45 = vpop.f32.mrf.mxu2 }
 0x9a8   :  { %v871_v47 = vsel %vm861_vm5, %v857_v45, 0.0 }
 0x9a9   :  { %872 = vadd.xlane.f32.xlu2 %v871_v47 }
 0x9b1   :  { %863 = vadd.xlane.f32.xlu2 %v862_v48 }
 0xa0c   :  { %v867_v49 = vpop.xlane.xlu1 %866 }
 0xa0d   :  { %v875_v50 = vmul.f32 0.083333336, %v867_v49 }
 0xa0f   :  { %v879_v53 = vsub.f32 %v851_v41, %v875_v50 }
 0xa11   :  { %v1862_v54 = vmul.f32 %v1859_v51, %v879_v53 }
 0xa13   :  { %v890_v55 = vmul.f32 %v1862_v54, %v1862_v54 }
 0xa14   :  { %v870_v56 = vpop.xlane.xlu0 %869 }
 0xa15   :  { %v876_v57 = vmul.f32 0.083333336, %v870_v56  ;;  %v896_v58 = vsel %vm861_vm5, %v890_v55, 0.0 }
 0xa16   :  { %897 = vadd.xlane.f32.xlu2 %v896_v58 }
 0xa17   :  { %v880_v59 = vsub.f32 %v854_v43, %v876_v57 }
 0xa19   :  { %v1868_v60 = vmul.f32 %v1859_v51, %v880_v59 }
 0xa1b   :  { %v891_v61 = vmul.f32 %v1868_v60, %v1868_v60 }
 0xa1c   :  { %v873_v62 = vpop.xlane.xlu2 %872 }
 0xa1d   :  { %v877_v63 = vmul.f32 0.083333336, %v873_v62  ;;  %v899_v0 = vsel %vm861_vm5, %v891_v61, 0.0 }
 0xa1e   :  { %900 = vadd.xlane.f32.xlu1 %v899_v0 }
 0xa1f   :  { %v881_v1 = vsub.f32 %v857_v45, %v877_v63 }
 0xa21   :  { %v1874_v2 = vmul.f32 %v1859_v51, %v881_v1 }
 0xa23   :  { %v892_v3 = vmul.f32 %v1874_v2, %v1874_v2 }
 0xa24   :  { %v864_v4 = vpop.xlane.xlu2 %863 }
 0xa25   :  { %v874_v5 = vmul.f32 0.083333336, %v864_v4  ;;  %v902_v6 = vsel %vm861_vm5, %v892_v3, 0.0 }
 0xa26   :  { %903 = vadd.xlane.f32.xlu0 %v902_v6 }
 0xa27   :  { %v878_v7 = vsub.f32 %v848_v40, %v874_v5 }
 0xa29   :  { %v1880_v8 = vmul.f32 %v1859_v51, %v878_v7 }
 0xa2b   :  { %v889_v9 = vmul.f32 %v1880_v8, %v1880_v8 }
 0xa2d   :  { %v893_v10 = vsel %vm861_vm5, %v889_v9, 0.0 }
 0xa2e   :  { %894 = vadd.xlane.f32.xlu0 %v893_v10 }
 0xa42   :  { %1002 = vperm.xlu0 %1451, %v956_v11  }
 0xa4a   :  { %997 = vperm.xlu0 %1451, %v955_v12  }
 0xa52   :  { %987 = vperm.xlu0 %1451, %v1888_v13  }
 0xa89   :  { %v898_v14 = vpop.xlane.xlu2 %897 }
 0xa8a   :  { %v906_v15 = vmul.f32 0.083333336, %v898_v14 }
 0xa8c   :  { %v910_v16 = vadd.f32 1e-05, %v906_v15 }
 0xa8e   :  { %1476 = vrsqrt.f32 %v910_v16  ;;  %vm929_vm0 = vweird.f32 %v910_v16 }
 0xa91   :  { %v901_v17 = vpop.xlane.xlu1 %900 }
 0xa92   :  { %v907_v18 = vmul.f32 0.083333336, %v901_v17 }
 0xa94   :  { %v1477_v19 = vpop.eup %1476  ;;  %v911_v20 = vadd.f32 1e-05, %v907_v18 }
 0xa95   :  { %v924_v21 = vmul.f32 %v1477_v19, %v910_v16  ;;  %vm930_vm15 = vweird.f32 %v1477_v19 }
 0xa96   :  { %1478 = vrsqrt.f32 %v911_v20  ;;  %vm931_vm1 = vmor %vm929_vm0, %vm930_vm15  ;;  %vm939_vm3 = vweird.f32 %v911_v20  ;;  %vm1039_vm15 = vcmask 121856   ;;  %vm1061_vm0 = vcmask 785408  }
 0xa97   :  { %v925_v22 = vmul.f32 %v1477_v19, %v924_v21 }
 0xa99   :  { %v926_v23 = vmul.f32 0.5, %v925_v22  ;;  %v904_v24 = vpop.xlane.xlu0 %903 }
 0xa9a   :  { %v908_v25 = vmul.f32 0.083333336, %v904_v24 }
 0xa9b   :  { %v927_v26 = vsub.f32 1.5, %v926_v23 }
 0xa9c   :  { %v1479_v27 = vpop.eup %1478  ;;  %v912_v28 = vadd.f32 1e-05, %v908_v25 }
 0xa9d   :  { %v934_v29 = vmul.f32 %v1479_v27, %v911_v20  ;;  %v928_v30 = vmul.f32 %v1477_v19, %v927_v26  ;;  %vm940_vm2 = vweird.f32 %v1479_v27 }
 0xa9e   :  { %1480 = vrsqrt.f32 %v912_v28  ;;  %vm941_vm4 = vmor %vm939_vm3, %vm940_vm2  ;;  %vm949_vm7 = vweird.f32 %v912_v28 }
 0xa9f   :  { %v935_v32 = vmul.f32 %v1479_v27, %v934_v29  ;;  %v932_v33 = vsel %vm931_vm1, %v1477_v19, %v928_v30  ;;  %vm1122_vm1 = vcmask 48128  }
 0xaa0   :  { %v958_v34 = vmul.f32 %v954_v31, %v932_v33 }
 0xaa1   :  { %v936_v35 = vmul.f32 0.5, %v935_v32  ;;  %v895_v36 = vpop.xlane.xlu0 %894 }
 0xaa2   :  { %v905_v37 = vmul.f32 0.083333336, %v895_v36  ;;  %968 = vperm.xlu1 %1453, %v958_v34   ;;  %v1021_v34 = vld [vmem:[%s1970_s19] sm:$0xff] }
 0xaa3   :  { %v937_v38 = vsub.f32 1.5, %v936_v35  ;;  %v1022_v35 = vld [vmem:[%s1970_s19 + $0x8] sm:$0xff]  ;;  %v1091_v36 = vld [vmem:[%s1969_s14] sm:$0xff] }
 0xaa4   :  { %v1481_v39 = vpop.eup %1480  ;;  %v909_v40 = vadd.f32 1e-05, %v905_v37 }
 0xaa5   :  { %v944_v41 = vmul.f32 %v1481_v39, %v912_v28  ;;  %v938_v42 = vmul.f32 %v1479_v27, %v937_v38  ;;  %vm950_vm6 = vweird.f32 %v1481_v39  ;;  %v1092_v28 = vld [vmem:[%s1969_s14 + $0x8] sm:$0xff] }
 0xaa6   :  { %1482 = vrsqrt.f32 %v909_v40  ;;  %vm951_vm8 = vmor %vm949_vm7, %vm950_vm6  ;;  %vm919_vm10 = vweird.f32 %v909_v40  ;;  %1113 = vmatpush.msra.mxu1 %v1092_v28 }
 0xaa7   :  { %v945_v43 = vmul.f32 %v1481_v39, %v944_v41  ;;  %v942_v44 = vsel %vm941_vm4, %v1479_v27, %v938_v42 }
 0xaa8   :  { %v959_v45 = vmul.f32 %v955_v12, %v942_v44  ;;  %1114 = vmatpush.msra.mxu1 %v1091_v36  ;;  %v1211_v36 = vld [vmem:[%s1972_s2] sm:$0xff] }
 0xaa9   :  { %v946_v47 = vmul.f32 0.5, %v945_v43 }
 0xaaa   :  { %973 = vperm.xlu2 %1448, %v959_v45  }
 0xaab   :  { %v947_v48 = vsub.f32 1.5, %v946_v47 }
 0xaac   :  { %v1483_v49 = vpop.eup %1482 }
 0xaad   :  { %v914_v50 = vmul.f32 %v1483_v49, %v909_v40  ;;  %v948_v53 = vmul.f32 %v1481_v39, %v947_v48  ;;  %vm920_vm9 = vweird.f32 %v1483_v49 }
 0xaae   :  { %vm921_vm11 = vmor %vm919_vm10, %vm920_vm9 }
 0xaaf   :  { %v915_v55 = vmul.f32 %v1483_v49, %v914_v50  ;;  %v952_v56 = vsel %vm951_vm8, %v1481_v39, %v948_v53 }
 0xab0   :  { %v960_v57 = vmul.f32 %v956_v11, %v952_v56 }
 0xab1   :  { %v916_v58 = vmul.f32 0.5, %v915_v55 }
 0xab2   :  { %978 = vperm.xlu1 %1453, %v960_v57   ;;  %v1166_v57 = vld [vmem:[%s1971_s6 + $0x8] sm:$0xff] }
 0xab3   :  { %v917_v59 = vsub.f32 1.5, %v916_v58 }
 0xab4   :  { %v1003_v0 = vpop.permute.xlu0 %1002 }
 0xab5   :  { %v918_v61 = vmul.f32 %v1483_v49, %v917_v59 }
 0xab7   :  { %v922_v62 = vsel %vm921_vm11, %v1483_v49, %v918_v61 }
 0xab8   :  { %v957_v63 = vmul.f32 %v1888_v13, %v922_v62 }
 0xaba   :  { %963 = vperm.xlu2 %1448, %v957_v63   ;;  %1454 = vset.pattern.permute.xlu1 %v1576_v52 }
 0xabb   :  { %992 = vperm.xlu1 %1454, %v954_v31  }
 0xabc   :  { %v998_v4 = vpop.permute.xlu0 %997 }
 0xac3   :  { %1455 = vset.pattern.permute.xlu1 %v1574_v46 }
 0xac4   :  { %v988_v16 = vpop.permute.xlu0 %987 }
 0xb04   :  { %v974_v1 = vpop.permute.xlu2 %973 }
 0xb05   :  { %v983_v3 = vmul.f32 %v974_v1, %v1868_v60 }
 0xb07   :  { %v1007_v5 = vadd.f32 %v998_v4, %v983_v3 }
 0xb09   :  { %v1011_v6 = vmul.f32 0.2, %v1007_v5 }
 0xb0b   :  { %v1015_v7 = vmax.f32 %v1007_v5, %v1011_v6 }
 0xb0d   :  { %v1019_v9 = vmul.f32 %v1859_v51, %v1015_v7 }
 0xb0f   :  { %1048 = vrot.lane.b32.xlu1 %v1019_v9, %s1573_s23 }
 0xb14   :  { %v969_v10 = vpop.permute.xlu1 %968  ;;  %v964_v11 = vpop.permute.xlu2 %963 }
 0xb15   :  { %v981_v13 = vmul.f32 %v964_v11, %v1880_v8  ;;  %v982_v19 = vmul.f32 %v969_v10, %v1862_v54  ;;  %v1165_v11 = vld [vmem:[%s1971_s6] sm:$0xff] }
 0xb17   :  { %v1005_v17 = vadd.f32 %v988_v16, %v981_v13 }
 0xb19   :  { %v1009_v20 = vmul.f32 0.2, %v1005_v17 }
 0xb1b   :  { %v1013_v24 = vmax.f32 %v1005_v17, %v1009_v20 }
 0xb1d   :  { %v1017_v26 = vmul.f32 %v1859_v51, %v1013_v24 }
 0xb24   :  { %v979_v12 = vpop.permute.xlu1 %978 }
 0xb25   :  { %v984_v14 = vmul.f32 %v979_v12, %v1874_v2 }
 0xb27   :  { %v1008_v15 = vadd.f32 %v1003_v0, %v984_v14 }
 0xb29   :  { %v1012_v18 = vmul.f32 0.2, %v1008_v15 }
 0xb2b   :  { %v1016_v60 = vmax.f32 %v1008_v15, %v1012_v18 }
 0xb2d   :  { %v993_v21 = vpop.permute.xlu1 %992  ;;  %v1020_v22 = vmul.f32 %v1859_v51, %v1016_v60 }
 0xb2e   :  { %v1006_v23 = vadd.f32 %v993_v21, %v982_v19 }
 0xb2f   :  { %1050 = vrot.lane.b32.xlu2 %v1020_v22, %s1573_s23  ;;  %1033 = vrot.lane.b32.xlu1 %v1020_v22, %s1572_s22 }
 0xb30   :  { %v1010_v8 = vmul.f32 0.2, %v1006_v23 }
 0xb32   :  { %v1014_v2 = vmax.f32 %v1006_v23, %v1010_v8 }
 0xb34   :  { %v1018_v25 = vmul.f32 %v1859_v51, %v1014_v2 }
 0xb36   :  { %1046 = vrot.lane.b32.xlu0 %v1018_v25, %s1573_s23 }
 0xb37   :  { %1027 = vrot.lane.b32.xlu1 %v1017_v26, %s1572_s22  ;;  %1044 = vrot.lane.b32.xlu2 %v1017_v26, %s1573_s23 }
 0xb3e   :  { %1031 = vrot.lane.b32.xlu0 %v1019_v9, %s1572_s22 }
 0xb3f   :  { %1029 = vrot.lane.b32.xlu2 %v1018_v25, %s1572_s22 }
 0xb81   :  { %v1049_v27 = vpop.permute.xlu1 %1048 }
 0xb89   :  { %v1051_v54 = vpop.permute.xlu2 %1050 }
 0xb8a   :  { %1393 = vmatpush.msk.msrb.mxu0 %vm1056_vm14, %v1051_v54 }
 0xb8c   :  { %1394 = vmatpush.msk.msrb.mxu0 %vm1056_vm14, %v1049_v27 }
 0xb91   :  { %v1045_v29 = vpop.permute.xlu2 %1044 }
 0xb99   :  { %v1030_v32 = vpop.permute.xlu2 %1029 }
 0xba1   :  { %v1034_v30 = vpop.permute.xlu1 %1033 }
 0xba8   :  { %v1047_v51 = vpop.permute.xlu0 %1046 }
 0xba9   :  { %1395 = vmatpush.msk.msrb.mxu0 %vm1056_vm14, %v1047_v51  ;;  %v1028_v33 = vpop.permute.xlu1 %1027 }
 0xbab   :  { %1396 = vmatpush.msk.msrb.mxu0 %vm1056_vm14, %v1045_v29  ;;  %v1216_v29 = vld [vmem:[%s1715_s20 + $0x10] sm:$0xff] }
 0xbad   :  { %1397 = vmatpush.msk.msrb.mxu0 %vm1039_vm15, %v1034_v30 }
 0xbb0   :  { %v1032_v31 = vpop.permute.xlu0 %1031 }
 0xbb1   :  { %1398 = vmatpush.msk.msrb.mxu0 %vm1039_vm15, %v1032_v31 }
 0xbb3   :  { %1399 = vmatpush.msk.msrb.mxu0 %vm1039_vm15, %v1030_v32 }
 0xbb5   :  { %1400 = vmatpush.msk.msrb.mxu0 %vm1039_vm15, %v1028_v33  ;;  %v1271_v33 = vld [vmem:[#allocation3] sm:$0x1] }
 0xbb7   :  { %1080 = vmatpush.msrb.mxu0 %v1020_v22 }
 0xbb9   :  { %1081 = vmatpush.msrb.mxu0 %v1019_v9 }
 0xbbb   :  { %1082 = vmatpush.msrb.mxu0 %v1018_v25 }
 0xbbd   :  { %1083 = vmatpush.msrb.mxu0 %v1017_v26 }
 0xbbe   :  { %1401 = vmatmul.msk.f32.vlgmr.msrb.gmra.mxu0 %vm1061_vm0, %v1021_v34 }
 0xbc6   :  { %1402 = vmatmul.msk.f32.gmra.mxu0 %vm1061_vm0, %v1022_v35 }
 0xc3b   :  { %v1085_v37 = vpop.f32.mrf.mxu0 }
 0xc3c   :  { %1403 = vmatmul.msk.f32.vlgmr.msra.gmra.mxu1 %vm861_vm5, %v1085_v37  ;;  %v1212_v37 = vld [vmem:[%s1972_s2 + $0x8] sm:$0xff] }
 0xc43   :  { %v1088_v38 = vpop.f32.mrf.mxu0 }
 0xc44   :  { %1404 = vmatmul.msk.f32.gmra.mxu1 %vm861_vm5, %v1088_v38  ;;  %v1213_v38 = vld [vmem:[%s1972_s2 + $0x10] sm:$0xff] }
 0xcb9   :  { %v1116_v39 = vpop.f32.mrf.mxu1 }
 0xcba   :  { %v1123_v40 = vsel %vm1122_vm1, %v1116_v39, 0.0 }
 0xcbb   :  { %1124 = vadd.xlane.f32.xlu2 %v1123_v40 }
 0xcc1   :  { %v1119_v41 = vpop.f32.mrf.mxu1 }
 0xcc2   :  { %v1126_v42 = vsel %vm1122_vm1, %v1119_v41, 0.0 }
 0xcc3   :  { %1127 = vadd.xlane.f32.xlu0 %v1126_v42 }
 0xd2e   :  { %v1125_v43 = vpop.xlane.xlu2 %1124 }
 0xd2f   :  { %v1129_v44 = vmul.f32 0.16666667, %v1125_v43 }
 0xd31   :  { %v1131_v45 = vsub.f32 %v1116_v39, %v1129_v44 }
 0xd33   :  { %v1133_v47 = vmul.f32 %v1131_v45, %v1131_v45 }
 0xd35   :  { %v1135_v48 = vsel %vm1122_vm1, %v1133_v47, 0.0 }
 0xd36   :  { %1136 = vadd.xlane.f32.xlu0 %v1135_v48  ;;  %v1128_v49 = vpop.xlane.xlu0 %1127 }
 0xd37   :  { %v1130_v50 = vmul.f32 0.16666667, %v1128_v49 }
 0xd39   :  { %v1132_v53 = vsub.f32 %v1119_v41, %v1130_v50 }
 0xd3b   :  { %v1134_v55 = vmul.f32 %v1132_v53, %v1132_v53 }
 0xd3d   :  { %v1138_v56 = vsel %vm1122_vm1, %v1134_v55, 0.0  ;;  %v1270_v55 = vld [vmem:[%s1720_s30] sm:$0x1]  ;;  %s1526_s30 = scalar_lea.hbm %s1525_s3, 1 }
 0xd3e   :  { %1139 = vadd.xlane.f32.xlu1 %v1138_v56  ;;  %p1527_p5 = scmp.ne.s32.totalorder %s1525_s3, %s1526_s30  ;;  %p1530_p7 = scmp.lt.s32.totalorder %s1528_s28, %s1526_s30 }
 0xd40   :  { %p1531_p8 = por %p1530_p7, %p1529_p6 }
 0xd42   :  { %p1532_p9 = pnand %p1531_p8, %p1527_p5 }
 0xd4a   :  { %1188 = vperm.xlu0 %1451, %v1166_v57  }
 0xd52   :  { %1468 = vset.pattern.permute.xlu0 %v1574_v46 }
 0xda9   :  { %v1137_v58 = vpop.xlane.xlu0 %1136 }
 0xdaa   :  { %v1141_v59 = vmul.f32 0.16666667, %v1137_v58 }
 0xdac   :  { %v1143_v61 = vadd.f32 1e-05, %v1141_v59 }
 0xdae   :  { %1484 = vrsqrt.f32 %v1143_v61  ;;  %vm1151_vm2 = vweird.f32 %v1143_v61 }
 0xdb1   :  { %v1140_v62 = vpop.xlane.xlu1 %1139 }
 0xdb2   :  { %v1142_v63 = vmul.f32 0.16666667, %v1140_v62 }
 0xdb4   :  { %v1485_v0 = vpop.eup %1484  ;;  %v1144_v1 = vadd.f32 1e-05, %v1142_v63 }
 0xdb5   :  { %v1146_v3 = vmul.f32 %v1485_v0, %v1143_v61  ;;  %vm1152_vm5 = vweird.f32 %v1485_v0 }
 0xdb6   :  { %1486 = vrsqrt.f32 %v1144_v1  ;;  %vm1153_vm3 = vmor %vm1151_vm2, %vm1152_vm5  ;;  %vm1161_vm6 = vweird.f32 %v1144_v1 }
 0xdb7   :  { %v1147_v4 = vmul.f32 %v1485_v0, %v1146_v3 }
 0xdb9   :  { %v1148_v5 = vmul.f32 0.5, %v1147_v4 }
 0xdbb   :  { %v1149_v6 = vsub.f32 1.5, %v1148_v5 }
 0xdbc   :  { %v1487_v7 = vpop.eup %1486  ;;  %v1189_v21 = vpop.permute.xlu0 %1188 }
 0xdbd   :  { %v1156_v9 = vmul.f32 %v1487_v7, %v1144_v1  ;;  %v1150_v10 = vmul.f32 %v1485_v0, %v1149_v6  ;;  %vm1162_vm4 = vweird.f32 %v1487_v7 }
 0xdbe   :  { %vm1163_vm7 = vmor %vm1161_vm6, %vm1162_vm4 }
 0xdbf   :  { %v1157_v12 = vmul.f32 %v1487_v7, %v1156_v9  ;;  %v1154_v13 = vsel %vm1153_vm3, %v1485_v0, %v1150_v10 }
 0xdc0   :  { %v1167_v14 = vmul.f32 %v1165_v11, %v1154_v13 }
 0xdc1   :  { %v1158_v15 = vmul.f32 0.5, %v1157_v12 }
 0xdc2   :  { %1171 = vperm.xlu1 %1455, %v1167_v14  }
 0xdc3   :  { %v1159_v16 = vsub.f32 1.5, %v1158_v15 }
 0xdc5   :  { %v1160_v17 = vmul.f32 %v1487_v7, %v1159_v16 }
 0xdc7   :  { %v1164_v18 = vsel %vm1163_vm7, %v1487_v7, %v1160_v17 }
 0xdc8   :  { %v1168_v60 = vmul.f32 %v1166_v57, %v1164_v18 }
 0xdca   :  { %1176 = vperm.xlu2 %1448, %v1168_v60  }
 0xdd2   :  { %1456 = vset.pattern.permute.xlu2 %v1576_v52  ;;  %v1215_v52 = vld [vmem:[%s1715_s20 + $0x8] sm:$0xff] }
 0xdd3   :  { %1183 = vperm.xlu2 %1456, %v1165_v11  }
 0xddb   :  { %1467 = vset.pattern.permute.xlu2 %v1574_v46  ;;  %v1214_v46 = vld [vmem:[%s1715_s20] sm:$0xff]  ;;  %s1578_s20 = smov [#allocation7]  }
 0xddc   :  { %1229 = vperm.xlu2 %1467, %v1216_v29   ;;  %s1310_s11 = sshll.u32 %s1578_s20, 4  ;;  %s1311_s11 = int_to_ptr.vmem [resolvable:$true] %s1310_s11 }
 0xde4   :  { %1274 = vperm.xlu2 %1467, %v1271_v33  }
 0xe24   :  { %v1177_v19 = vpop.permute.xlu2 %1176 }
 0xe25   :  { %v1180_v20 = vmul.f32 %v1177_v19, %v1132_v53 }
 0xe27   :  { %v1192_v22 = vadd.f32 %v1189_v21, %v1180_v20 }
 0xe29   :  { %v1194_v2 = vmul.f32 0.2, %v1192_v22 }
 0xe2b   :  { %v1196_v54 = vmax.f32 %v1192_v22, %v1194_v2 }
 0xe2d   :  { %v1184_v8 = vpop.permute.xlu2 %1183 }
 0xe34   :  { %v1172_v23 = vpop.permute.xlu1 %1171 }
 0xe35   :  { %v1179_v24 = vmul.f32 %v1172_v23, %v1131_v45 }
 0xe36   :  { %v1230_v42 = vpop.permute.xlu2 %1229 }
 0xe37   :  { %v1191_v25 = vadd.f32 %v1184_v8, %v1179_v24 }
 0xe39   :  { %v1193_v26 = vmul.f32 0.2, %v1191_v25 }
 0xe3b   :  { %v1195_v27 = vmax.f32 %v1191_v25, %v1193_v26 }
 0xe3d   :  { %v1462_v28 = vpack.i.bf16 %v1195_v27, %v1196_v54 }
 0xe3e   :  { %v1275_v56 = vpop.permute.xlu2 %1274 }
 0xe3f   :  { %1463 = vrot.lane.b32.xlu1 %v1462_v28, %s1573_s23  ;;  %1458 = vrot.lane.b32.xlu0 %v1462_v28, %s1577_s12  ;;  %v1277_v57 = vperm.slane %v1275_v56, 0 }
 0xe47   :  { %1219 = vperm.xlu1 %1455, %v1214_v46   ;;  %1224 = vperm.xlu0 %1468, %v1215_v52  }
 0xeb1   :  { %v1459_v51 = vpop.permute.xlu0 %1458  ;;  %v1464_v31 = vpop.permute.xlu1 %1463 }
 0xeb2   :  { %v1460_v30 = vunpack.i.l.bf16 %v1459_v51  ;;  %v1461_v32 = vunpack.i.h.bf16 %v1459_v51  ;;  %v1465_v34 = vunpack.i.l.bf16 %v1464_v31  ;;  %v1466_v35 = vunpack.i.h.bf16 %v1464_v31 }
 0xeb4   :  { %1251 = vmatpush.msrb.mxu1 %v1460_v30 }
 0xeb6   :  { %1252 = vmatpush.msrb.mxu1 %v1461_v32 }
 0xeb8   :  { %1253 = vmatpush.msrb.mxu1 %v1465_v34 }
 0xeb9   :  { %v1225_v41 = vpop.permute.xlu0 %1224  ;;  %v1220_v47 = vpop.permute.xlu1 %1219 }
 0xeba   :  { %1254 = vmatpush.msrb.mxu1 %v1466_v35 }
 0xebc   :  { %1255 = vmatpush.msrb.mxu1 %v1196_v54 }
 0xebe   :  { %1256 = vmatpush.msrb.mxu1 %v1195_v27 }
 0xebf   :  { %1405 = vmatmul.msk.f32.vlgmr.msrb.gmra.mxu1 %vm369_vm12, %v1211_v36 }
 0xec7   :  { %1406 = vmatmul.msk.f32.gmra.mxu1 %vm369_vm12, %v1212_v37 }
 0xecf   :  { %1407 = vmatmul.msk.f32.gmra.mxu1 %vm369_vm12, %v1213_v38  ;;  %vm1303_vm12 = vcmask 8192  }
 0xf3c   :  { %v1258_v39 = vpop.f32.mrf.mxu1 }
 0xf3d   :  { %v1259_v48 = vadd.f32 %v1258_v39, %v1220_v47 }
 0xf3f   :  { %v1267_v53 = vmax.f32 %v1259_v48, 0.0 }
 0xf44   :  { %v1261_v40 = vpop.f32.mrf.mxu1 }
 0xf45   :  { %v1262_v44 = vadd.f32 %v1261_v40, %v1225_v41 }
 0xf47   :  { %v1268_v50 = vmax.f32 %v1262_v44, 0.0 }
 0xf4c   :  { %v1264_v43 = vpop.f32.mrf.mxu1 }
 0xf4d   :  { %v1265_v45 = vadd.f32 %v1264_v43, %v1230_v42 }
 0xf4f   :  { %v1269_v49 = vmax.f32 %v1265_v45, 0.0 }
 0xf51   :  { %1294 = vmatpush.msra.mxu0 %v1269_v49 }
 0xf53   :  { %1295 = vmatpush.msra.mxu0 %v1268_v50 }
 0xf55   :  { %1296 = vmatpush.msra.mxu0 %v1267_v53 }
 0xf56   :  { %1408 = vmatmul.msk.f32.vlgmr.msra.gmra.mxu0 %vm768_vm13, %v1270_v55 }
 0xfd3   :  { %v1298_v58 = vpop.f32.mrf.mxu0 }
 0xfd4   :  { %v1299_v59 = vadd.f32 %v1298_v58, %v1277_v57 }
 0xfd6   :  { %v1301_v61 = vmax.f32 %v1299_v59, 0.0 }
 0xfd8   :  { %v1302_v62 = vmin.f32 %v1301_v61, 1.0 }
 0xfda   :  { %1304 = vst.msk [vmem:[#allocation7] sm:$0x1] %vm1303_vm12, %v1302_v62 }
 0xfdb   :  { %1535 = shalt.err (!%p1532_p9)
}
 0xfdc   :  { %1315 = dma.vmem_to_hbm [thread:$0]  %s1311_s11, 16, %s1313_s26, [#allocation6]  }
 0xfdd   :  { %1538 = dma.done.wait [#allocation6], 16  }
 0xfde   :  { %1539 = vsyncadd [#allocation6], 4294967280 }
 0xfdf   :  { %1320 = vsyncpa [#allocation5], 1 }
 0xfe0   :  { %1321 = vsyncpa [#allocation6], 1 }

</bundles_post_ra>
